<compile_context>
chip_gen: v7x
topology: tpu7x:2x2x1
jax: 0.10.0
libtpu: 0.0.40
codegen_flags: <defaults>
</compile_context>

<pallas_src>
import functools
import math

import jax
import jax.numpy as jnp
from jax import lax
from jax.experimental import pallas as pl
from jax.experimental.pallas import tpu as pltpu

_LANES = 128                      # TPU vreg lane width.
_CHUNK = 256                      # rows per inner-loop chunk inside a block.
_TARGET_STEPS = 8                 # aim for >= this many grid steps when possible.
_MIN_PALLAS_ELEMS = 128 * 1024    # below this, plain XLA is already at roofline.


def _round_up(v, m):
    return -(-v // m) * m


def _pipeline_vmem_budget():
    """VMEM bytes allowed for the double-buffered input/output pipeline."""
    cap = None
    try:
        cap = getattr(pltpu.get_tpu_info(), "vmem_capacity_bytes", None)
    except Exception:
        cap = None
    if not cap:
        cap = 64 << 20  # conservative: assume v7x-sized (64 MiB) physical VMEM
    # Use at most ~half of physical VMEM for pipeline buffers, capped at 40 MiB
    # (v5e/v6e: 40 MiB of 128 MiB physical; v7x: 28 MiB of 64 MiB physical).
    return int(max(8 << 20, min(cap // 2 - (4 << 20), 40 << 20)))


# ---------------------------------------------------------------------------
# Packed path: D | 128, 8 <= D <= 64.  Inputs viewed as (rows/g, 128), g=128/D.
# ---------------------------------------------------------------------------
def _packed_dot_kernel(x_ref, y_ref, o_ref, *, d, scale, chunk):
    """x_ref/y_ref: (bm, 128) slabs holding g = 128//d rows of length d each.
    o_ref: (bm, g) with o[i, j] = dot of packed row j of slab i."""
    bm, lanes = x_ref.shape
    g = lanes // d

    # Segment masks / one-hot columns: a handful of vregs, computed once per grid
    # step (hoisted out of the chunk loop, captured as loop constants).
    lane_id = lax.broadcasted_iota(jnp.int32, (1, lanes), 1)
    col_id = lax.broadcasted_iota(jnp.int32, (1, g), 1)
    seg_masks = [(lane_id >= j * d) & (lane_id < (j + 1) * d) for j in range(g)]
    col_onehot = [(col_id == j).astype(jnp.float32) for j in range(g)]

    def body(i, carry):
        s = pl.multiple_of(i * chunk, chunk)
        x = x_ref[pl.ds(s, chunk), :].astype(jnp.float32)
        y = y_ref[pl.ds(s, chunk), :].astype(jnp.float32)
        p = x * y
        r = jnp.zeros((chunk, g), jnp.float32)
        for j in range(g):  # g is a small static int (2..16)
            sj = jnp.sum(jnp.where(seg_masks[j], p, 0.0), axis=-1, keepdims=True)
            r = r + sj * col_onehot[j]
        if scale is not None:
            r = r * scale
        o_ref[pl.ds(s, chunk), :] = r.astype(o_ref.dtype)
        return carry

    lax.fori_loop(0, bm // chunk, body, 0)


def _packed_path(x, y, d, scale, out_dtype, cost):
    n_rows = x.shape[0]
    g = _LANES // d                       # original rows packed per 128-lane row
    pad = (-n_rows) % g
    if pad:
        # Tiny pad (< g rows) only when misaligned, to legalise the otherwise
        # zero-copy (rows/g, 128) reshape.
        x = jnp.pad(x, ((0, pad), (0, 0)))
        y = jnp.pad(y, ((0, pad), (0, 0)))
    n_pad = n_rows + pad
    r2 = n_pad // g
    xr = x.reshape(r2, _LANES)            # free reshape (row-major bitcast)
    yr = y.reshape(r2, _LANES)

    isz1, isz2 = x.dtype.itemsize, y.dtype.itemsize
    osz = jnp.dtype(out_dtype).itemsize
    budget = _pipeline_vmem_budget()
    # Per pipelined row: x + y + the (minor-dim padded to 128 lanes) output row,
    # all double-buffered.
    per_row = _LANES * (isz1 + isz2 + osz)
    bm = max(_CHUNK, (budget // (2 * per_row)) // _CHUNK * _CHUNK)
    # Keep >= ~_TARGET_STEPS grid steps so v7x can shard across both TensorCores
    # and the pipeline has steps to overlap.
    bm = min(bm, _round_up(pl.cdiv(r2, _TARGET_STEPS), _CHUNK))

    out = pl.pallas_call(
        functools.partial(_packed_dot_kernel, d=d, scale=scale, chunk=_CHUNK),
        out_shape=jax.ShapeDtypeStruct((r2, g), out_dtype),
        grid=(pl.cdiv(r2, bm),),
        in_specs=[pl.BlockSpec((bm, _LANES), lambda i: (i, 0)),
                  pl.BlockSpec((bm, _LANES), lambda i: (i, 0))],
        out_specs=pl.BlockSpec((bm, g), lambda i: (i, 0)),
        compiler_params=pltpu.CompilerParams(
            dimension_semantics=("parallel",),
            vmem_limit_bytes=budget + (8 << 20)),
        cost_estimate=cost,
    )(xr, yr)
    return out.reshape(n_pad)[:n_rows]


# ---------------------------------------------------------------------------
# Fallback path: any D (used for D >= 128 or D not dividing 128).
# Rows packed 128-per-slab -> lane-dense (bm, 128) output tiles.
# ---------------------------------------------------------------------------
def _rowslab_dot_kernel(x_ref, y_ref, o_ref, *, scale):
    x = x_ref[...].astype(jnp.float32)
    y = y_ref[...].astype(jnp.float32)
    s = jnp.sum(x * y, axis=-1)           # (bm, 128), lane-dense
    if scale is not None:
        s = s * scale
    o_ref[...] = s.astype(o_ref.dtype)


def _rowslab_path(x, y, d, scale, out_dtype, cost):
    n_rows = x.shape[0]
    pad = (-n_rows) % _LANES
    if pad:
        # Pad only when misaligned, at 128-row granularity (independent of the
        # much larger block size).
        x = jnp.pad(x, ((0, pad), (0, 0)))
        y = jnp.pad(y, ((0, pad), (0, 0)))
    n_pad = n_rows + pad
    r = n_pad // _LANES
    xr = x.reshape(r, _LANES, d)
    yr = y.reshape(r, _LANES, d)

    d_pad = _round_up(d, _LANES)           # VMEM pads the minor dim to 128 lanes
    isz1, isz2 = x.dtype.itemsize, y.dtype.itemsize
    osz = jnp.dtype(out_dtype).itemsize
    budget = _pipeline_vmem_budget()
    # Keep one block's f32 temporaries around ~2 MiB (bounded vreg/VMEM pressure in
    # the unchunked body) and the double-buffered pipeline within the budget.
    bm_tmp = max(1, (2 << 20) // (_LANES * d_pad * 4))
    bm_vmem = max(1, budget // (2 * _LANES * (d_pad * (isz1 + isz2) + osz)))
    bm = max(1, min(bm_tmp, bm_vmem, r))

    out = pl.pallas_call(
        functools.partial(_rowslab_dot_kernel, scale=scale),
        out_shape=jax.ShapeDtypeStruct((r, _LANES), out_dtype),
        grid=(pl.cdiv(r, bm),),
        in_specs=[pl.BlockSpec((bm, _LANES, d), lambda i: (i, 0, 0)),
                  pl.BlockSpec((bm, _LANES, d), lambda i: (i, 0, 0))],
        out_specs=pl.BlockSpec((bm, _LANES), lambda i: (i, 0)),
        compiler_params=pltpu.CompilerParams(
            dimension_semantics=("parallel",),
            vmem_limit_bytes=budget + (8 << 20)),
        cost_estimate=cost,
    )(xr, yr)
    return out.reshape(n_pad)[:n_rows]


# ---------------------------------------------------------------------------
# Public entry point.
# ---------------------------------------------------------------------------
def dot_product_similarity(tensor_1, tensor_2, *, scale_output=False,
                           min_pallas_elements=_MIN_PALLAS_ELEMS):
    """Pallas TPU implementation of DotProductSimilarity.forward."""
    if tensor_1.shape != tensor_2.shape:
        raise ValueError("tensor_1 and tensor_2 must have identical shapes")
    *lead, d = tensor_1.shape
    n_rows = math.prod(lead) if lead else 1
    out_dtype = jnp.result_type(tensor_1.dtype, tensor_2.dtype)
    floating = jnp.issubdtype(out_dtype, jnp.floating)

    # Fast path: tiny problems (custom-call / padding overhead dominates — e.g. the
    # motivating (2, 8, 32) RL shapes) and non-float dtypes (exact integer
    # accumulation, matching PyTorch).
    if (not floating) or n_rows * d <= min_pallas_elements or n_rows < _LANES:
        if floating:
            r = jnp.sum(tensor_1.astype(jnp.float32) * tensor_2.astype(jnp.float32),
                        axis=-1)
            if scale_output:
                r = r * (1.0 / math.sqrt(d))
            return r.astype(out_dtype)
        r = jnp.sum(tensor_1 * tensor_2, axis=-1)
        if scale_output:
            r = r / math.sqrt(d)
        return r

    scale = (1.0 / math.sqrt(d)) if scale_output else None
    x = tensor_1.reshape(n_rows, d)
    y = tensor_2.reshape(n_rows, d)
    cost = pl.CostEstimate(
        flops=2 * n_rows * d,
        transcendentals=0,
        bytes_accessed=n_rows * d * (x.dtype.itemsize + y.dtype.itemsize)
        + n_rows * jnp.dtype(out_dtype).itemsize,
    )

    use_packed = False
    if d in (8, 16, 32, 64):
        g = _LANES // d
        r2 = (n_rows + (-n_rows) % g) // g
        use_packed = r2 >= _CHUNK
    if use_packed:
        flat = _packed_path(x, y, d, scale, out_dtype, cost)
    else:
        flat = _rowslab_path(x, y, d, scale, out_dtype, cost)
    return flat.reshape(tuple(lead))


if __name__ == "__main__":
    key = jax.random.PRNGKey(0)
    ks = jax.random.split(key, 8)

    def ref(a, b, scale_output):
        r = jnp.sum(a.astype(jnp.float32) * b.astype(jnp.float32), axis=-1)
        if scale_output:
            r = r / math.sqrt(a.shape[-1])
        return r.astype(jnp.result_type(a.dtype, b.dtype))

    checks = []

    # 1) Tiny motivating td3 shape (plain-XLA fast path).
    a = jax.random.normal(ks[0], (2, 8, 32), jnp.float32)
    b = jax.random.normal(ks[1], (2, 8, 32), jnp.float32)
    checks.append((dot_product_similarity(a, b), ref(a, b, False), 1e-5))
    checks.append((dot_product_similarity(a, b, scale_output=True), ref(a, b, True), 1e-5))

    # 2) Packed Pallas path (D=32 divides 128), aligned row count.
    a = jax.random.normal(ks[2], (8, 1024, 32), jnp.float32)
    b = jax.random.normal(ks[3], (8, 1024, 32), jnp.float32)
    checks.append((dot_product_similarity(a, b), ref(a, b, False), 1e-4))
    checks.append((dot_product_similarity(a, b, scale_output=True), ref(a, b, True), 1e-4))

    # 3) Packed path with misaligned rows (tiny pad + partial last grid block).
    a = jax.random.normal(ks[4], (5, 1001, 32), jnp.float32)
    b = jax.random.normal(ks[5], (5, 1001, 32), jnp.float32)
    checks.append((dot_product_similarity(a, b), ref(a, b, False), 1e-4))

    # 4) Row-slab fallback path (D does not divide 128), misaligned rows.
    a = jax.random.normal(ks[6], (3, 300, 160), jnp.float32)
    b = jax.random.normal(ks[7], (3, 300, 160), jnp.float32)
    checks.append((dot_product_similarity(a, b), ref(a, b, False), 1e-4))

    jax.block_until_ready([c[0] for c in checks])
    for got, want, tol in checks:
        assert got.shape == want.shape, (got.shape, want.shape)
        assert jnp.allclose(got, want, atol=tol, rtol=tol), (got.shape,)

    print("KERNEL_OK")
</pallas_src>

<mosaic_0001>
module attributes {stable_mosaic.version = 11 : i64} {
  func.func @_packed_dot_kernel(%arg0: i32, %arg1: memref<256x128xf32, #tpu.memory_space<vmem>>, %arg2: memref<256x128xf32, #tpu.memory_space<vmem>>, %arg3: memref<256x4xf32, #tpu.memory_space<vmem>>) attributes {dimension_semantics = [#tpu.dimension_semantics<parallel>], iteration_bounds = array<i64: 8>, scalar_prefetch = 0 : i64, scratch_operands = 0 : i64, tpu.core_type = #tpu.core_type<tc>, window_params = [{transform_indices = @transform_0, window_bounds = array<i64: 256, 128>}, {transform_indices = @transform_1, window_bounds = array<i64: 256, 128>}, {transform_indices = @transform_2, window_bounds = array<i64: 256, 4>}]} {
    %0 = tpu.iota {dimensions = array<i32: 1>} : vector<1x128xi32>
    %1 = tpu.iota {dimensions = array<i32: 1>} : vector<1x4xi32>
    %c0_i32 = arith.constant 0 : i32
    %2 = vector.broadcast %c0_i32 : i32 to vector<1x128xi32>
    %3 = arith.cmpi sge, %0, %2 : vector<1x128xi32>
    %c32_i32 = arith.constant 32 : i32
    %4 = vector.broadcast %c32_i32 : i32 to vector<1x128xi32>
    %5 = arith.cmpi slt, %0, %4 : vector<1x128xi32>
    %6 = arith.andi %3, %5 : vector<1x128xi1>
    %c32_i32_0 = arith.constant 32 : i32
    %7 = vector.broadcast %c32_i32_0 : i32 to vector<1x128xi32>
    %8 = arith.cmpi sge, %0, %7 : vector<1x128xi32>
    %c64_i32 = arith.constant 64 : i32
    %9 = vector.broadcast %c64_i32 : i32 to vector<1x128xi32>
    %10 = arith.cmpi slt, %0, %9 : vector<1x128xi32>
    %11 = arith.andi %8, %10 : vector<1x128xi1>
    %c64_i32_1 = arith.constant 64 : i32
    %12 = vector.broadcast %c64_i32_1 : i32 to vector<1x128xi32>
    %13 = arith.cmpi sge, %0, %12 : vector<1x128xi32>
    %c96_i32 = arith.constant 96 : i32
    %14 = vector.broadcast %c96_i32 : i32 to vector<1x128xi32>
    %15 = arith.cmpi slt, %0, %14 : vector<1x128xi32>
    %16 = arith.andi %13, %15 : vector<1x128xi1>
    %c96_i32_2 = arith.constant 96 : i32
    %17 = vector.broadcast %c96_i32_2 : i32 to vector<1x128xi32>
    %18 = arith.cmpi sge, %0, %17 : vector<1x128xi32>
    %c128_i32 = arith.constant 128 : i32
    %19 = vector.broadcast %c128_i32 : i32 to vector<1x128xi32>
    %20 = arith.cmpi slt, %0, %19 : vector<1x128xi32>
    %21 = arith.andi %18, %20 : vector<1x128xi1>
    %c0_i32_3 = arith.constant 0 : i32
    %22 = vector.broadcast %c0_i32_3 : i32 to vector<1x4xi32>
    %23 = arith.cmpi eq, %1, %22 : vector<1x4xi32>
    %24 = arith.extui %23 : vector<1x4xi1> to vector<1x4xi32>
    %25 = arith.sitofp %24 : vector<1x4xi32> to vector<1x4xf32>
    %c1_i32 = arith.constant 1 : i32
    %26 = vector.broadcast %c1_i32 : i32 to vector<1x4xi32>
    %27 = arith.cmpi eq, %1, %26 : vector<1x4xi32>
    %28 = arith.extui %27 : vector<1x4xi1> to vector<1x4xi32>
    %29 = arith.sitofp %28 : vector<1x4xi32> to vector<1x4xf32>
    %c2_i32 = arith.constant 2 : i32
    %30 = vector.broadcast %c2_i32 : i32 to vector<1x4xi32>
    %31 = arith.cmpi eq, %1, %30 : vector<1x4xi32>
    %32 = arith.extui %31 : vector<1x4xi1> to vector<1x4xi32>
    %33 = arith.sitofp %32 : vector<1x4xi32> to vector<1x4xf32>
    %c3_i32 = arith.constant 3 : i32
    %34 = vector.broadcast %c3_i32 : i32 to vector<1x4xi32>
    %35 = arith.cmpi eq, %1, %34 : vector<1x4xi32>
    %36 = arith.extui %35 : vector<1x4xi1> to vector<1x4xi32>
    %37 = arith.sitofp %36 : vector<1x4xi32> to vector<1x4xf32>
    %c0_i32_4 = arith.constant 0 : i32
    %c256_i32 = arith.constant 256 : i32
    %38 = arith.muli %c0_i32_4, %c256_i32 : i32
    %39 = tpu.assume_multiple %38, 256 : i32
    %40 = arith.index_cast %39 : i32 to index
    %c0 = arith.constant 0 : index
    %41 = vector.load %arg1[%40, %c0] : memref<256x128xf32, #tpu.memory_space<vmem>>, vector<256x128xf32>
    %42 = arith.index_cast %39 : i32 to index
    %c0_5 = arith.constant 0 : index
    %43 = vector.load %arg2[%42, %c0_5] : memref<256x128xf32, #tpu.memory_space<vmem>>, vector<256x128xf32>
    %44 = arith.mulf %41, %43 : vector<256x128xf32>
    %cst = arith.constant 0.000000e+00 : f32
    %45 = vector.broadcast %cst : f32 to vector<256x4xf32>
    %cst_6 = arith.constant 0.000000e+00 : f32
    %46 = vector.shape_cast %6 : vector<1x128xi1> to vector<1x128xi1>
    %47 = vector.broadcast %46 : vector<1x128xi1> to vector<256x128xi1>
    %48 = vector.broadcast %cst_6 : f32 to vector<256x128xf32>
    %49 = arith.select %47, %44, %48 : vector<256x128xi1>, vector<256x128xf32>
    %cst_7 = arith.constant dense<0.000000e+00> : vector<256xf32>
    %50 = vector.multi_reduction <add>, %49, %cst_7 [1] : vector<256x128xf32> to vector<256xf32>
    %51 = vector.shape_cast %50 : vector<256xf32> to vector<256x1xf32>
    %52 = vector.broadcast %51 : vector<256x1xf32> to vector<256x4xf32>
    %53 = vector.broadcast %25 : vector<1x4xf32> to vector<256x4xf32>
    %54 = arith.mulf %52, %53 : vector<256x4xf32>
    %55 = arith.addf %45, %54 : vector<256x4xf32>
    %cst_8 = arith.constant 0.000000e+00 : f32
    %56 = vector.shape_cast %11 : vector<1x128xi1> to vector<1x128xi1>
    %57 = vector.broadcast %56 : vector<1x128xi1> to vector<256x128xi1>
    %58 = vector.broadcast %cst_8 : f32 to vector<256x128xf32>
    %59 = arith.select %57, %44, %58 : vector<256x128xi1>, vector<256x128xf32>
    %cst_9 = arith.constant dense<0.000000e+00> : vector<256xf32>
    %60 = vector.multi_reduction <add>, %59, %cst_9 [1] : vector<256x128xf32> to vector<256xf32>
    %61 = vector.shape_cast %60 : vector<256xf32> to vector<256x1xf32>
    %62 = vector.broadcast %61 : vector<256x1xf32> to vector<256x4xf32>
    %63 = vector.broadcast %29 : vector<1x4xf32> to vector<256x4xf32>
    %64 = arith.mulf %62, %63 : vector<256x4xf32>
    %65 = arith.addf %55, %64 : vector<256x4xf32>
    %cst_10 = arith.constant 0.000000e+00 : f32
    %66 = vector.shape_cast %16 : vector<1x128xi1> to vector<1x128xi1>
    %67 = vector.broadcast %66 : vector<1x128xi1> to vector<256x128xi1>
    %68 = vector.broadcast %cst_10 : f32 to vector<256x128xf32>
    %69 = arith.select %67, %44, %68 : vector<256x128xi1>, vector<256x128xf32>
    %cst_11 = arith.constant dense<0.000000e+00> : vector<256xf32>
    %70 = vector.multi_reduction <add>, %69, %cst_11 [1] : vector<256x128xf32> to vector<256xf32>
    %71 = vector.shape_cast %70 : vector<256xf32> to vector<256x1xf32>
    %72 = vector.broadcast %71 : vector<256x1xf32> to vector<256x4xf32>
    %73 = vector.broadcast %33 : vector<1x4xf32> to vector<256x4xf32>
    %74 = arith.mulf %72, %73 : vector<256x4xf32>
    %75 = arith.addf %65, %74 : vector<256x4xf32>
    %cst_12 = arith.constant 0.000000e+00 : f32
    %76 = vector.shape_cast %21 : vector<1x128xi1> to vector<1x128xi1>
    %77 = vector.broadcast %76 : vector<1x128xi1> to vector<256x128xi1>
    %78 = vector.broadcast %cst_12 : f32 to vector<256x128xf32>
    %79 = arith.select %77, %44, %78 : vector<256x128xi1>, vector<256x128xf32>
    %cst_13 = arith.constant dense<0.000000e+00> : vector<256xf32>
    %80 = vector.multi_reduction <add>, %79, %cst_13 [1] : vector<256x128xf32> to vector<256xf32>
    %81 = vector.shape_cast %80 : vector<256xf32> to vector<256x1xf32>
    %82 = vector.broadcast %81 : vector<256x1xf32> to vector<256x4xf32>
    %83 = vector.broadcast %37 : vector<1x4xf32> to vector<256x4xf32>
    %84 = arith.mulf %82, %83 : vector<256x4xf32>
    %85 = arith.addf %75, %84 : vector<256x4xf32>
    %86 = arith.index_cast %39 : i32 to index
    %c0_14 = arith.constant 0 : index
    %87 = vector.load %arg3[%86, %c0_14] : memref<256x4xf32, #tpu.memory_space<vmem>>, vector<256x4xf32>
    tpu.vector_store %arg3[%86, %c0_14], %85 {strides = array<i32>} : memref<256x4xf32, #tpu.memory_space<vmem>>, vector<256x4xf32>,
    %c1_i32_15 = arith.constant 1 : i32
    return
  }
  func.func @transform_0(%arg0: i32) -> (i32, i32) {
    %c0_i32 = arith.constant 0 : i32
    %c0_i32_0 = arith.constant 0 : i32
    return %arg0, %c0_i32 : i32, i32
  }
  func.func @transform_1(%arg0: i32) -> (i32, i32) {
    %c0_i32 = arith.constant 0 : i32
    %c0_i32_0 = arith.constant 0 : i32
    return %arg0, %c0_i32 : i32, i32
  }
  func.func @transform_2(%arg0: i32) -> (i32, i32) {
    %c0_i32 = arith.constant 0 : i32
    %c0_i32_0 = arith.constant 0 : i32
    return %arg0, %c0_i32 : i32, i32
  }
}

</mosaic_0001>

<bundles_post_ra>
// kernel: tpu_custom_call.1
= control target key start
LH: loop header
LB: loop body
LE: loop exit
PB: predicated region body
PF: predicated region fallthrough
CT: control target
= control target key end

     0   :  { %7 = vsyncpa [#allocation3], 0  ;;  %s2466_s0 = inlined_call_operand.hbm [shape: f32[2048,128], index: 0, kind: input, shape index: {}]   ;;  %s2467_s1 = inlined_call_operand.hbm [shape: f32[2048,128], index: 1, kind: input, shape index: {}]   ;;  %s2468_s2 = inlined_call_operand.vmem [shape: f32[2048,4], index: 2, kind: output, shape index: {}]  }
   0x1   :  { %9 = vsyncpa [#allocation3 + $0x1], 0 }
   0x2   :  { %10 = vsyncpa [#allocation5], 0 }
   0x3   :  { %12 = vsyncpa [#allocation5 + $0x1], 0  ;;  %s1290_s9 = smov 0   ;;  %s1292_s10 = smov 0  }
   0x4   :  { %s1294_s11 = smov 0   ;;  %s1296_s12 = smov 0  }
   0x5 LB: > { %s1100_s13 = sadd.s32 4294967295, %s1268_s12   ;;  %s1310_s14 = sadd.s32 1, %s1268_s12   ;;  %s1268_s12 = sphi %s1296_s12, %s2521_s12   ;;  %s1264_s11 = sphi %s1294_s11, %s2520_s11   ;;  %s1260_s10 = sphi %s1292_s10, %s2519_s10   ;;  %s1256_s9 = sphi %s1290_s9, %s2518_s9  }
   0x6   : > { %s22_s15 = ssub.s32 %s1268_s12, %s1310_s14  ;;  %s25_s16 = sadd.s32 1, %s1264_s11 }
   0x7   : > { %p23_p0 = scmp.eq.s32.totalorder %s22_s15, 0  ;;  %p32_p1 = scmp.ne.s32.totalorder %s1264_s11, %s1260_s10 }
   0x8   : > { %p33_p2 = scmp.eq.s32.totalorder %s1268_s12, 0  ;;  %p38_p3 = scmp.ne.s32.totalorder %s1260_s10, %s1256_s9 }
   0x9   : > { %s1320_s17 = scalar_select %p23_p0, %s1264_s11, %s25_s16  }
   0xa   : > { %p34_p4 = por %p33_p2, %p32_p1  ;;  %p39_p5 = scmp.eq.s32.totalorder %s1100_s13, 0 }
   0xb   : > { %p1134_p6 = scmp.lt.s32.totalorder %s1268_s12, 8  ;;  %s1330_s19 = sand.u32 1, %s1264_s11  }
   0xc   : > { %p1325_p7 = por %p39_p5, %p38_p3  ;;  %s1104_s20 = sshll.u32 %s1330_s19, 8 }
   0xd   : > { %s1121_s21 = sshll.u32 %s1268_s12, 12  ;;  %s118_s25 = scalar_lea.vmem [#allocation2], %s1104_s20 }
   0xe   : > { %s2472_s18 = scalar_select %p1325_p7, 1, 0 }
   0xf   : > { %s1339_s24 = scalar_lea.hbm %s2466_s0, %s1121_s21  ;;  %s125_s26 = sshll.u32 %s118_s25, 4  ;;  %s1343_s26 = int_to_ptr.vmem [resolvable:$true] %s125_s26 }
  0x10   : > { %p1345_p8 = pnand %p1134_p6, %p34_p4  ;;  %s115_s28 = scalar_lea.sflag [#allocation3], %s1330_s19 }
  0x11   : > { %s1170_s29 = scalar_lea.hbm %s1339_s24, 4096  ;;  %s1175_s4 = scalar_lea.hbm %s2466_s0, 32768 }
  0x12   : > { %p1171_p10 = scmp.ne.s32.totalorder %s1339_s24, %s1170_s29  ;;  %p1172_p11 = pneg %p1345_p8 }
  0x13   : > { %p1176_p0 = scmp.lt.u32.totalorder %s1339_s24, %s2466_s0  ;;  %p1177_p1 = scmp.lt.u32.totalorder %s1175_s4, %s1170_s29 }
  0x14   : > { %p1173_p12 = pnand %p1172_p11, %p1171_p10  ;;  %p1179_p3 = scmp.lt.u32.totalorder %s1170_s29, %s1339_s24 }
  0x15   : > { %p1178_p2 = por %p1177_p1, %p1176_p0 }
  0x16   : > { %p1174_p13 = pneg %p1173_p12 }
  0x17   : > { %p1180_p4 = por %p1179_p3, %p1178_p2 }
  0x19   : > { %p1181_p5 = pnand %p1180_p4, %p1174_p13 }
  0x1b   : > { %1184 = shalt.err (!%p1181_p5)
}
  0x1c   : > { %s1185_s7 = scalar_lea.vmem %s1343_s26, 4096  ;;  %s1270_s8 = smov [#allocation2]  }
  0x1d   : > { %p1186_p6 = scmp.ne.s32.totalorder %s1343_s26, %s1185_s7  ;;  %s1190_s9 = sshll.u32 %s1270_s8, 4  ;;  %s1191_s9 = int_to_ptr.vmem [resolvable:$false] %s1190_s9 }
  0x1e   : > { %s1192_s15 = scalar_lea.vmem %s1191_s9, 8192  ;;  %p1193_p9 = scmp.lt.s32.totalorder %s1343_s26, %s1191_s9 }
  0x1f   : > { %p1188_p10 = pnand %p1186_p6, %p1172_p11  ;;  %p1194_p0 = scmp.lt.s32.totalorder %s1192_s15, %s1185_s7 }
  0x21   : > { %p1189_p12 = pneg %p1188_p10  ;;  %p1195_p1 = por %p1194_p0, %p1193_p9 }
  0x23   : > { %p1196_p2 = pnand %p1195_p1, %p1189_p12 }
  0x25   : > { %1199 = shalt.err (!%p1196_p2)
}
  0x26   : > { %s1271_s16 = smov 128   ;;  %s1272_s22 = smov 8  }
  0x27   : > { %1130 = dma.hbm_to_vmem [thread:$0]  (!%p1345_p8), %s1339_s24, 4096, %s1343_s26, %s115_s28, %s1271_s16, %s1271_s16, %s1272_s22  }
  0x28   : > { %p154_p9 = scmp.lt.s32.totalorder %s1268_s12, 9  ;;  %s1387_s29 = scalar_lea.hbm %s2467_s1, %s1121_s21 }
  0x29   : > { %p2474_p13 = scmp.ge.s32.totalorder %s1268_s12, 1  ;;  %s139_s3 = scalar_lea.vmem [#allocation4], %s1104_s20 }
  0x2a   : > { %s146_s4 = sshll.u32 %s139_s3, 4  ;;  %s136_s24 = scalar_lea.sflag [#allocation5], %s1330_s19  ;;  %s1397_s4 = int_to_ptr.vmem [resolvable:$true] %s146_s4 }
  0x2b   : > { %p1391_p3 = pnand %p2474_p13, %p154_p9  ;;  %s1200_s26 = scalar_lea.hbm %s1387_s29, 4096 }
  0x2c   : > { %p1201_p4 = scmp.ne.s32.totalorder %s1387_s29, %s1200_s26  ;;  %s1205_s5 = scalar_lea.hbm %s2467_s1, 32768 }
  0x2d   : > { %p1206_p10 = scmp.lt.u32.totalorder %s1387_s29, %s2467_s1  ;;  %p1207_p12 = scmp.lt.u32.totalorder %s1205_s5, %s1200_s26 }
  0x2e   : > { %p1203_p5 = pnand %p1201_p4, %p1172_p11  ;;  %p1209_p1 = scmp.lt.u32.totalorder %s1200_s26, %s1387_s29 }
  0x2f   : > { %p1208_p0 = por %p1207_p12, %p1206_p10 }
  0x30   : > { %p1204_p6 = pneg %p1203_p5 }
  0x31   : > { %p1210_p2 = por %p1209_p1, %p1208_p0 }
  0x33   : > { %p1211_p9 = pnand %p1210_p2, %p1204_p6 }
  0x35   : > { %1214 = shalt.err (!%p1211_p9)
}
  0x36   : > { %s1215_s20 = scalar_lea.vmem %s1397_s4, 4096  ;;  %s1273_s8 = smov [#allocation4]  }
  0x37   : > { %p1216_p13 = scmp.ne.s32.totalorder %s1397_s4, %s1215_s20  ;;  %s1220_s9 = sshll.u32 %s1273_s8, 4  ;;  %s1221_s9 = int_to_ptr.vmem [resolvable:$false] %s1220_s9 }
  0x38   : > { %s1222_s15 = scalar_lea.vmem %s1221_s9, 8192  ;;  %p1223_p7 = scmp.lt.s32.totalorder %s1397_s4, %s1221_s9 }
  0x39   : > { %p1218_p4 = pnand %p1216_p13, %p1172_p11  ;;  %p1224_p10 = scmp.lt.s32.totalorder %s1222_s15, %s1215_s20 }
  0x3b   : > { %p1219_p5 = pneg %p1218_p4  ;;  %p1225_p12 = por %p1224_p10, %p1223_p7 }
  0x3d   : > { %p1226_p0 = pnand %p1225_p12, %p1219_p5 }
  0x3f   : > { %1229 = shalt.err (!%p1226_p0)
}
  0x40   : > { %1133 = dma.hbm_to_vmem [thread:$0]  (!%p1345_p8), %s1387_s29, 4096, %s1397_s4, %s136_s24, %s1271_s16, %s1271_s16, %s1272_s22  }
  0x41   : > { %158 = sbr.rel (%p1391_p3) target bundleno = 483 (0x1e3), region = 28 }
  0x48   : > { %s160_s23 = sand.u32 1, %s1260_s10   ;;  %p2476_p7 = scmp.ne.s32.totalorder %s2472_s18, 0 }
  0x49   : > { %s1111_s25 = sshll.u32 %s160_s23, 8  ;;  %s161_s3 = scalar_lea.sflag [#allocation3], %s160_s23 }
  0x4a   : > { %s1431_s26 = scalar_lea.vmem [#allocation2], %s1111_s25 }
  0x4b   : > { %1247 = dma.done.wait (%p2476_p7), %s161_s3, 4096  }
  0x4c   : > { %1249 = vsyncadd (%p2476_p7), %s161_s3, 4294963200  ;;  %s170_s19 = scalar_lea.sflag [#allocation5], %s160_s23  ;;  %s1437_s27 = scalar_lea.vmem [#allocation4], %s1111_s25 }
  0x4d   : > { %1251 = dma.done.wait (%p2476_p7), %s170_s19, 4096  }
  0x4e   : > { %1253 = vsyncadd (%p2476_p7), %s170_s19, 4294963200  ;;  %v207_v0 = vlaneseq  ;;  %v235_v2 = vld [vmem:[%s1431_s26 + $0x10] sm:$0xff]  ;;  %v233_v4 = vld [vmem:[%s1431_s26] sm:$0xff]  ;;  %s1113_s18 = sshll.u32 %s1100_s13, 5  ;;  %vm977_vm12 = vcmask 31744  }
  0x4f   : > { %v267_v3 = vld [vmem:[%s1437_s27 + $0x10] sm:$0xff]  ;;  %v265_v6 = vld [vmem:[%s1437_s27] sm:$0xff]  ;;  %v236_v7 = vld [vmem:[%s1431_s26 + $0x18] sm:$0xff]  ;;  %p202_p8 = scmp.lt.s32.totalorder %s1113_s18, 255 }
  0x50   : > { %v1443_v1 = vand.u32 127, %v207_v0  ;;  %v1449_v5 = vmul.f32 %v267_v3, %v235_v2  ;;  %v268_v8 = vld [vmem:[%s1437_s27 + $0x18] sm:$0xff]  ;;  %v1454_v9 = vmul.f32 %v265_v6, %v233_v4  ;;  %v234_v11 = vld [vmem:[%s1431_s26 + $0x8] sm:$0xff]  ;;  %v237_v17 = vld [vmem:[%s1431_s26 + $0x20] sm:$0xff] }
  0x51   : > { %v1456_v10 = vmul.f32 %v268_v8, %v236_v7  ;;  %v266_v12 = vld [vmem:[%s1437_s27 + $0x8] sm:$0xff]  ;;  %v269_v18 = vld [vmem:[%s1437_s27 + $0x20] sm:$0xff]  ;;  %v240_v24 = vld [vmem:[%s1431_s26 + $0x38] sm:$0xff]  ;;  %s2523_s18 = smov (!%p202_p8, %s1113_s18), 255 }
  0x52   : > { %vm210_vm0 = vcmp.lt.s32.totalorder %v1443_v1, 32  ;;  %v238_v13 = vld [vmem:[%s1431_s26 + $0x28] sm:$0xff]  ;;  %v1464_v15 = vmul.f32 %v266_v12, %v234_v11  ;;  %v1480_v23 = vmul.f32 %v269_v18, %v237_v17  ;;  %v272_v25 = vld [vmem:[%s1437_s27 + $0x38] sm:$0xff]  ;;  %v239_v26 = vld [vmem:[%s1431_s26 + $0x30] sm:$0xff]  ;;  %vm212_vm1 = vcmp.ge.s32.totalorder %v1443_v1, 32  ;;  %s1114_s12 = sshll.u32 %s2523_s18, 3 }
  0x53   : > { %v333_v14 = vsel %vm210_vm0, %v1449_v5, 0.0  ;;  %v270_v16 = vld [vmem:[%s1437_s27 + $0x28] sm:$0xff]  ;;  %v331_v19 = vsel %vm210_vm0, %v1454_v9, 0.0  ;;  %v334_v20 = vsel %vm210_vm0, %v1456_v10, 0.0  ;;  %v271_v27 = vld [vmem:[%s1437_s27 + $0x30] sm:$0xff]  ;;  %v1489_v29 = vmul.f32 %v272_v25, %v240_v24  ;;  %v241_v34 = vld [vmem:[%s1431_s26 + $0x40] sm:$0xff]  ;;  %s2273_s22 = scalar_lea.vmem %s2468_s2, %s1114_s12 }
  0x54   : > { %367 = vadd.xlane.f32.xlu1 %v333_v14  ;;  %363 = vadd.xlane.f32.xlu0 %v331_v19  ;;  %v1475_v21 = vmul.f32 %v270_v16, %v238_v13  ;;  %v332_v22 = vsel %vm210_vm0, %v1464_v15, 0.0  ;;  %v335_v30 = vsel %vm210_vm0, %v1480_v23, 0.0  ;;  %v1494_v31 = vmul.f32 %v271_v27, %v239_v26  ;;  %v242_v32 = vld [vmem:[%s1431_s26 + $0x48] sm:$0xff]  ;;  %v273_v35 = vld [vmem:[%s1437_s27 + $0x40] sm:$0xff]  ;;  %v244_v40 = vld [vmem:[%s1431_s26 + $0x58] sm:$0xff] }
  0x55   : > { %v274_v33 = vld [vmem:[%s1437_s27 + $0x48] sm:$0xff]  ;;  %v338_v36 = vsel %vm210_vm0, %v1489_v29, 0.0  ;;  %v1508_v39 = vmul.f32 %v273_v35, %v241_v34  ;;  %v276_v41 = vld [vmem:[%s1437_s27 + $0x58] sm:$0xff]  ;;  %v243_v42 = vld [vmem:[%s1431_s26 + $0x50] sm:$0xff]  ;;  %vm213_vm2 = vcmp.lt.s32.totalorder %v1443_v1, 64  ;;  %vm215_vm4 = vcmp.ge.s32.totalorder %v1443_v1, 64 }
  0x56   : > { %v336_v28 = vsel %vm210_vm0, %v1475_v21, 0.0  ;;  %v1503_v37 = vmul.f32 %v274_v33, %v242_v32  ;;  %v337_v38 = vsel %vm210_vm0, %v1494_v31, 0.0  ;;  %v275_v43 = vld [vmem:[%s1437_s27 + $0x50] sm:$0xff]  ;;  %v1517_v45 = vmul.f32 %v276_v41, %v244_v40  ;;  %v246_v48 = vld [vmem:[%s1431_s26 + $0x68] sm:$0xff]  ;;  %v245_v50 = vld [vmem:[%s1431_s26 + $0x60] sm:$0xff] }
  0x57   : > { %v339_v46 = vsel %vm210_vm0, %v1508_v39, 0.0  ;;  %v1522_v47 = vmul.f32 %v275_v43, %v243_v42  ;;  %v278_v49 = vld [vmem:[%s1437_s27 + $0x68] sm:$0xff]  ;;  %v277_v51 = vld [vmem:[%s1437_s27 + $0x60] sm:$0xff]  ;;  %v248_v56 = vld [vmem:[%s1431_s26 + $0x78] sm:$0xff]  ;;  %vm216_vm5 = vcmp.lt.s32.totalorder %v1443_v1, 96  ;;  %vm218_vm7 = vcmp.ge.s32.totalorder %v1443_v1, 96 }
  0x58   : > { %369 = vadd.xlane.f32.xlu1 %v334_v20  ;;  %365 = vadd.xlane.f32.xlu0 %v332_v22  ;;  %v340_v44 = vsel %vm210_vm0, %v1503_v37, 0.0  ;;  %v342_v52 = vsel %vm210_vm0, %v1517_v45, 0.0  ;;  %v1531_v53 = vmul.f32 %v278_v49, %v246_v48  ;;  %v1536_v55 = vmul.f32 %v277_v51, %v245_v50  ;;  %v280_v57 = vld [vmem:[%s1437_s27 + $0x78] sm:$0xff]  ;;  %v247_v58 = vld [vmem:[%s1431_s26 + $0x70] sm:$0xff]  ;;  %v250_v0 = vld [vmem:[%s1431_s26 + $0x88] sm:$0xff] }
  0x59   : > { %v341_v54 = vsel %vm210_vm0, %v1522_v47, 0.0  ;;  %v279_v59 = vld [vmem:[%s1437_s27 + $0x70] sm:$0xff]  ;;  %v1545_v61 = vmul.f32 %v280_v57, %v248_v56  ;;  %v282_v2 = vld [vmem:[%s1437_s27 + $0x88] sm:$0xff]  ;;  %v249_v3 = vld [vmem:[%s1431_s26 + $0x80] sm:$0xff]  ;;  %vm224_vm8 = vcmp.eq.s32.totalorder %v1443_v1, 1  ;;  %vm221_vm9 = vcmp.eq.s32.totalorder %v1443_v1, 0 }
  0x5a   : > { %v344_v60 = vsel %vm210_vm0, %v1531_v53, 0.0  ;;  %v343_v62 = vsel %vm210_vm0, %v1536_v55, 0.0  ;;  %v1550_v63 = vmul.f32 %v279_v59, %v247_v58  ;;  %v281_v4 = vld [vmem:[%s1437_s27 + $0x80] sm:$0xff]  ;;  %v1559_v7 = vmul.f32 %v282_v2, %v250_v0  ;;  %v252_v12 = vld [vmem:[%s1431_s26 + $0x98] sm:$0xff]  ;;  %v251_v14 = vld [vmem:[%s1431_s26 + $0x90] sm:$0xff] }
  0x5b   : > { %v346_v6 = vsel %vm210_vm0, %v1545_v61, 0.0  ;;  %v1564_v11 = vmul.f32 %v281_v4, %v249_v3  ;;  %v284_v13 = vld [vmem:[%s1437_s27 + $0x98] sm:$0xff]  ;;  %v283_v16 = vld [vmem:[%s1437_s27 + $0x90] sm:$0xff]  ;;  %v254_v22 = vld [vmem:[%s1431_s26 + $0xa8] sm:$0xff]  ;;  %vm227_vm10 = vcmp.eq.s32.totalorder %v1443_v1, 2  ;;  %vm230_vm11 = vcmp.eq.s32.totalorder %v1443_v1, 3 }
  0x5c   : > { %373 = vadd.xlane.f32.xlu1 %v336_v28  ;;  %371 = vadd.xlane.f32.xlu0 %v335_v30  ;;  %v345_v8 = vsel %vm210_vm0, %v1550_v63, 0.0  ;;  %v348_v17 = vsel %vm210_vm0, %v1559_v7, 0.0  ;;  %v1573_v18 = vmul.f32 %v284_v13, %v252_v12  ;;  %v1578_v20 = vmul.f32 %v283_v16, %v251_v14  ;;  %v286_v24 = vld [vmem:[%s1437_s27 + $0xa8] sm:$0xff]  ;;  %v253_v25 = vld [vmem:[%s1431_s26 + $0xa0] sm:$0xff]  ;;  %v256_v33 = vld [vmem:[%s1431_s26 + $0xb8] sm:$0xff] }
  0x5d   : > { %v347_v19 = vsel %vm210_vm0, %v1564_v11, 0.0  ;;  %v285_v26 = vld [vmem:[%s1437_s27 + $0xa0] sm:$0xff]  ;;  %v1587_v28 = vmul.f32 %v286_v24, %v254_v22  ;;  %v288_v34 = vld [vmem:[%s1437_s27 + $0xb8] sm:$0xff]  ;;  %v255_v35 = vld [vmem:[%s1431_s26 + $0xb0] sm:$0xff] }
  0x5e   : > { %v350_v27 = vsel %vm210_vm0, %v1573_v18, 0.0  ;;  %v349_v30 = vsel %vm210_vm0, %v1578_v20, 0.0  ;;  %v1592_v32 = vmul.f32 %v285_v26, %v253_v25  ;;  %v1601_v40 = vmul.f32 %v288_v34, %v256_v33  ;;  %v258_v43 = vld [vmem:[%s1431_s26 + $0xc8] sm:$0xff]  ;;  %v289_v48 = vld [vmem:[%s1437_s27 + $0xc0] sm:$0xff]  ;;  %v292_v56 = vld [vmem:[%s1437_s27 + $0xd8] sm:$0xff] }
  0x5f   : > { %v259_v57 = vld [vmem:[%s1431_s26 + $0xd0] sm:$0xff]  ;;  %v262_v2 = vld [vmem:[%s1431_s26 + $0xe8] sm:$0xff]  ;;  %v261_v4 = vld [vmem:[%s1431_s26 + $0xe0] sm:$0xff] }
  0x60   : > { %377 = vadd.xlane.f32.xlu1 %v338_v36  ;;  %375 = vadd.xlane.f32.xlu0 %v337_v38  ;;  %v287_v36 = vld [vmem:[%s1437_s27 + $0xb0] sm:$0xff]  ;;  %v352_v38 = vsel %vm210_vm0, %v1587_v28, 0.0  ;;  %v351_v41 = vsel %vm210_vm0, %v1592_v32, 0.0  ;;  %v354_v49 = vsel %vm210_vm0, %v1601_v40, 0.0  ;;  %v294_v3 = vld [vmem:[%s1437_s27 + $0xe8] sm:$0xff]  ;;  %v264_v16 = vld [vmem:[%s1431_s26 + $0xf8] sm:$0xff] }
  0x61   : > { %v1606_v42 = vmul.f32 %v287_v36, %v255_v35  ;;  %v291_v58 = vld [vmem:[%s1437_s27 + $0xd0] sm:$0xff]  ;;  %v1643_v12 = vmul.f32 %v294_v3, %v262_v2  ;;  %vm1672_vm3 = vmand %vm212_vm1, %vm213_vm2 }
  0x62   : > { %v1634_v0 = vmul.f32 %v291_v58, %v259_v57  ;;  %v295_v22 = vld [vmem:[%s1437_s27 + $0xf0] sm:$0xff]  ;;  %v494_v35 = vsel %vm1672_vm3, %v1464_v15, 0.0  ;;  %v493_v36 = vsel %vm1672_vm3, %v1454_v9, 0.0  ;;  %v506_v57 = vsel %vm1672_vm3, %v1531_v53, 0.0  ;;  %vm1774_vm6 = vmand %vm215_vm4, %vm216_vm5 }
  0x63   : > { %v353_v51 = vsel %vm210_vm0, %v1606_v42, 0.0  ;;  %v360_v24 = vsel %vm210_vm0, %v1643_v12, 0.0  ;;  %v505_v58 = vsel %vm1672_vm3, %v1536_v55, 0.0  ;;  %v510_v2 = vsel %vm1672_vm3, %v1559_v7, 0.0 }
  0x64   : > { %381 = vadd.xlane.f32.xlu1 %v340_v44  ;;  %379 = vadd.xlane.f32.xlu0 %v339_v46  ;;  %v290_v44 = vld [vmem:[%s1437_s27 + $0xc8] sm:$0xff]  ;;  %v257_v46 = vld [vmem:[%s1431_s26 + $0xc0] sm:$0xff]  ;;  %v357_v13 = vsel %vm210_vm0, %v1634_v0, 0.0  ;;  %v509_v3 = vsel %vm1672_vm3, %v1564_v11, 0.0  ;;  %v658_v34 = vsel %vm1774_vm6, %v1456_v10, 0.0 }
  0x65   : > { %v1615_v50 = vmul.f32 %v290_v44, %v258_v43  ;;  %v498_v43 = vsel %vm1672_vm3, %v1475_v21, 0.0  ;;  %v497_v44 = vsel %vm1672_vm3, %v1480_v23, 0.0 }
  0x67   : > { %v356_v59 = vsel %vm210_vm0, %v1615_v50, 0.0 }
  0x68   : > { %385 = vadd.xlane.f32.xlu1 %v342_v52  ;;  %383 = vadd.xlane.f32.xlu0 %v341_v54  ;;  %v1620_v52 = vmul.f32 %v289_v48, %v257_v46  ;;  %v260_v54 = vld [vmem:[%s1431_s26 + $0xd8] sm:$0xff]  ;;  %v500_v46 = vsel %vm1672_vm3, %v1489_v29, 0.0  ;;  %v499_v48 = vsel %vm1672_vm3, %v1494_v31, 0.0 }
  0x6c   : > { %389 = vadd.xlane.f32.xlu1 %v344_v60  ;;  %387 = vadd.xlane.f32.xlu0 %v343_v62  ;;  %v1629_v60 = vmul.f32 %v292_v56, %v260_v54  ;;  %v355_v62 = vsel %vm210_vm0, %v1620_v52, 0.0  ;;  %v504_v54 = vsel %vm1672_vm3, %v1517_v45, 0.0  ;;  %v503_v56 = vsel %vm1672_vm3, %v1522_v47, 0.0 }
  0x70   : > { %393 = vadd.xlane.f32.xlu1 %v346_v6  ;;  %391 = vadd.xlane.f32.xlu0 %v345_v8  ;;  %v293_v6 = vld [vmem:[%s1437_s27 + $0xe0] sm:$0xff]  ;;  %v358_v8 = vsel %vm210_vm0, %v1629_v60, 0.0 }
  0x71   : > { %v1648_v14 = vmul.f32 %v293_v6, %v261_v4  ;;  %v512_v4 = vsel %vm1672_vm3, %v1573_v18, 0.0  ;;  %v511_v6 = vsel %vm1672_vm3, %v1578_v20, 0.0 }
  0x73   : > { %v359_v26 = vsel %vm210_vm0, %v1648_v14, 0.0 }
  0x74   : > { %397 = vadd.xlane.f32.xlu1 %v348_v17  ;;  %395 = vadd.xlane.f32.xlu0 %v347_v19  ;;  %v296_v17 = vld [vmem:[%s1437_s27 + $0xf8] sm:$0xff]  ;;  %v263_v19 = vld [vmem:[%s1431_s26 + $0xf0] sm:$0xff] }
  0x75   : > { %v1657_v25 = vmul.f32 %v296_v17, %v264_v16  ;;  %v516_v16 = vsel %vm1672_vm3, %v1601_v40, 0.0  ;;  %v515_v17 = vsel %vm1672_vm3, %v1606_v42, 0.0 }
  0x78   : > { %401 = vadd.xlane.f32.xlu1 %v350_v27  ;;  %399 = vadd.xlane.f32.xlu0 %v349_v30  ;;  %v1662_v27 = vmul.f32 %v295_v22, %v263_v19  ;;  %v362_v30 = vsel %vm210_vm0, %v1657_v25, 0.0  ;;  %v518_v19 = vsel %vm1672_vm3, %v1615_v50, 0.0  ;;  %v517_v22 = vsel %vm1672_vm3, %v1620_v52, 0.0 }
  0x7a   : > { %v361_v33 = vsel %vm210_vm0, %v1662_v27, 0.0 }
  0x7c   : > { %405 = vadd.xlane.f32.xlu1 %v352_v38  ;;  %403 = vadd.xlane.f32.xlu0 %v351_v41  ;;  %v496_v38 = vsel %vm1672_vm3, %v1456_v10, 0.0  ;;  %v495_v41 = vsel %vm1672_vm3, %v1449_v5, 0.0 }
  0x80   : > { %409 = vadd.xlane.f32.xlu1 %v354_v49  ;;  %407 = vadd.xlane.f32.xlu0 %v353_v51  ;;  %v502_v49 = vsel %vm1672_vm3, %v1503_v37, 0.0  ;;  %v501_v51 = vsel %vm1672_vm3, %v1508_v39, 0.0 }
  0x84   : > { %413 = vadd.xlane.f32.xlu1 %v356_v59  ;;  %411 = vadd.xlane.f32.xlu0 %v355_v62  ;;  %v508_v59 = vsel %vm1672_vm3, %v1545_v61, 0.0  ;;  %v507_v62 = vsel %vm1672_vm3, %v1550_v63, 0.0 }
  0x88   : > { %417 = vadd.xlane.f32.xlu1 %v358_v8  ;;  %415 = vadd.xlane.f32.xlu0 %v357_v13  ;;  %v514_v8 = vsel %vm1672_vm3, %v1587_v28, 0.0  ;;  %v513_v13 = vsel %vm1672_vm3, %v1592_v32, 0.0 }
  0x8c   : > { %421 = vadd.xlane.f32.xlu1 %v360_v24  ;;  %419 = vadd.xlane.f32.xlu0 %v359_v26  ;;  %v520_v24 = vsel %vm1672_vm3, %v1629_v60, 0.0  ;;  %v519_v26 = vsel %vm1672_vm3, %v1634_v0, 0.0 }
  0x90   : > { %425 = vadd.xlane.f32.xlu1 %v362_v30  ;;  %423 = vadd.xlane.f32.xlu0 %v361_v33  ;;  %v522_v30 = vsel %vm1672_vm3, %v1643_v12, 0.0  ;;  %v521_v33 = vsel %vm1672_vm3, %v1648_v14, 0.0 }
  0x94   : > { %527 = vadd.xlane.f32.xlu1 %v494_v35  ;;  %525 = vadd.xlane.f32.xlu0 %v493_v36  ;;  %v524_v35 = vsel %vm1672_vm3, %v1657_v25, 0.0  ;;  %v523_v36 = vsel %vm1672_vm3, %v1662_v27, 0.0 }
  0x98   : > { %531 = vadd.xlane.f32.xlu1 %v496_v38  ;;  %529 = vadd.xlane.f32.xlu0 %v495_v41  ;;  %v656_v41 = vsel %vm1774_vm6, %v1464_v15, 0.0 }
  0x9c   : > { %535 = vadd.xlane.f32.xlu1 %v498_v43  ;;  %533 = vadd.xlane.f32.xlu0 %v497_v44  ;;  %v655_v43 = vsel %vm1774_vm6, %v1454_v9, 0.0  ;;  %v657_v44 = vsel %vm1774_vm6, %v1449_v5, 0.0 }
  0xa0   : > { %539 = vadd.xlane.f32.xlu1 %v500_v46  ;;  %537 = vadd.xlane.f32.xlu0 %v499_v48  ;;  %v660_v46 = vsel %vm1774_vm6, %v1475_v21, 0.0  ;;  %v659_v48 = vsel %vm1774_vm6, %v1480_v23, 0.0 }
  0xa4   : > { %543 = vadd.xlane.f32.xlu1 %v502_v49  ;;  %541 = vadd.xlane.f32.xlu0 %v501_v51  ;;  %v662_v49 = vsel %vm1774_vm6, %v1489_v29, 0.0  ;;  %v661_v51 = vsel %vm1774_vm6, %v1494_v31, 0.0 }
  0xa8   : > { %547 = vadd.xlane.f32.xlu1 %v504_v54  ;;  %545 = vadd.xlane.f32.xlu0 %v503_v56  ;;  %v664_v56 = vsel %vm1774_vm6, %v1503_v37, 0.0 }
  0xac   : > { %551 = vadd.xlane.f32.xlu1 %v506_v57  ;;  %549 = vadd.xlane.f32.xlu0 %v505_v58  ;;  %v663_v58 = vsel %vm1774_vm6, %v1508_v39, 0.0 }
  0xb0   : > { %555 = vadd.xlane.f32.xlu1 %v508_v59  ;;  %553 = vadd.xlane.f32.xlu0 %v507_v62  ;;  %v666_v62 = vsel %vm1774_vm6, %v1517_v45, 0.0 }
  0xb4   : > { %559 = vadd.xlane.f32.xlu1 %v510_v2  ;;  %557 = vadd.xlane.f32.xlu0 %v509_v3  ;;  %v665_v3 = vsel %vm1774_vm6, %v1522_v47, 0.0 }
  0xb8   : > { %563 = vadd.xlane.f32.xlu1 %v512_v4  ;;  %561 = vadd.xlane.f32.xlu0 %v511_v6  ;;  %v668_v6 = vsel %vm1774_vm6, %v1531_v53, 0.0 }
  0xbc   : > { %567 = vadd.xlane.f32.xlu1 %v514_v8  ;;  %565 = vadd.xlane.f32.xlu0 %v513_v13  ;;  %v667_v13 = vsel %vm1774_vm6, %v1536_v55, 0.0 }
  0xc0   : > { %571 = vadd.xlane.f32.xlu1 %v516_v16  ;;  %569 = vadd.xlane.f32.xlu0 %v515_v17  ;;  %v670_v17 = vsel %vm1774_vm6, %v1545_v61, 0.0 }
  0xc4   : > { %575 = vadd.xlane.f32.xlu1 %v518_v19  ;;  %573 = vadd.xlane.f32.xlu0 %v517_v22  ;;  %v669_v22 = vsel %vm1774_vm6, %v1550_v63, 0.0 }
  0xc8   : > { %579 = vadd.xlane.f32.xlu1 %v520_v24  ;;  %577 = vadd.xlane.f32.xlu0 %v519_v26  ;;  %v672_v26 = vsel %vm1774_vm6, %v1559_v7, 0.0 }
  0xcc   : > { %583 = vadd.xlane.f32.xlu1 %v522_v30  ;;  %581 = vadd.xlane.f32.xlu0 %v521_v33  ;;  %v671_v33 = vsel %vm1774_vm6, %v1564_v11, 0.0 }
  0xd0   : > { %587 = vadd.xlane.f32.xlu1 %v524_v35  ;;  %585 = vadd.xlane.f32.xlu0 %v523_v36  ;;  %v674_v36 = vsel %vm1774_vm6, %v1573_v18, 0.0 }
  0xd4   : > { %689 = vadd.xlane.f32.xlu1 %v656_v41  ;;  %687 = vadd.xlane.f32.xlu0 %v655_v43  ;;  %v673_v43 = vsel %vm1774_vm6, %v1578_v20, 0.0 }
  0xd8   : > { %693 = vadd.xlane.f32.xlu1 %v658_v34  ;;  %691 = vadd.xlane.f32.xlu0 %v657_v44  ;;  %v676_v44 = vsel %vm1774_vm6, %v1587_v28, 0.0 }
  0xdc   : > { %697 = vadd.xlane.f32.xlu1 %v660_v46  ;;  %695 = vadd.xlane.f32.xlu0 %v659_v48  ;;  %v675_v48 = vsel %vm1774_vm6, %v1592_v32, 0.0 }
  0xe0   : > { %701 = vadd.xlane.f32.xlu1 %v662_v49  ;;  %699 = vadd.xlane.f32.xlu0 %v661_v51  ;;  %v678_v51 = vsel %vm1774_vm6, %v1601_v40, 0.0 }
  0xe1   : > { %v1802_v54 = vpop.xlane.xlu1 %367  ;;  %v1807_v57 = vpop.xlane.xlu0 %363 }
  0xe4   : > { %705 = vadd.xlane.f32.xlu1 %v664_v56  ;;  %703 = vadd.xlane.f32.xlu0 %v663_v58  ;;  %v677_v58 = vsel %vm1774_vm6, %v1606_v42, 0.0 }
  0xe5   : > { %v1812_v59 = vpop.xlane.xlu1 %369  ;;  %v1817_v2 = vpop.xlane.xlu0 %365 }
  0xe8   : > { %709 = vadd.xlane.f32.xlu1 %v666_v62  ;;  %707 = vadd.xlane.f32.xlu0 %v665_v3  ;;  %v680_v3 = vsel %vm1774_vm6, %v1615_v50, 0.0 }
  0xe9   : > { %v1822_v4 = vpop.xlane.xlu1 %373  ;;  %v1827_v8 = vpop.xlane.xlu0 %371 }
  0xec   : > { %713 = vadd.xlane.f32.xlu1 %v668_v6  ;;  %711 = vadd.xlane.f32.xlu0 %v667_v13  ;;  %v679_v13 = vsel %vm1774_vm6, %v1620_v52, 0.0 }
  0xed   : > { %v1832_v16 = vpop.xlane.xlu1 %377  ;;  %v1837_v19 = vpop.xlane.xlu0 %375 }
  0xf0   : > { %717 = vadd.xlane.f32.xlu1 %v670_v17  ;;  %715 = vadd.xlane.f32.xlu0 %v669_v22  ;;  %v682_v22 = vsel %vm1774_vm6, %v1629_v60, 0.0 }
  0xf1   : > { %v1842_v24 = vpop.xlane.xlu1 %381  ;;  %v1847_v30 = vpop.xlane.xlu0 %379 }
  0xf4   : > { %721 = vadd.xlane.f32.xlu1 %v672_v26  ;;  %719 = vadd.xlane.f32.xlu0 %v671_v33  ;;  %v681_v33 = vsel %vm1774_vm6, %v1634_v0, 0.0 }
  0xf5   : > { %v1852_v35 = vpop.xlane.xlu1 %385  ;;  %v1857_v41 = vpop.xlane.xlu0 %383 }
  0xf8   : > { %725 = vadd.xlane.f32.xlu1 %v674_v36  ;;  %723 = vadd.xlane.f32.xlu0 %v673_v43  ;;  %v684_v43 = vsel %vm1774_vm6, %v1643_v12, 0.0 }
  0xf9   : > { %v1862_v34 = vpop.xlane.xlu1 %389  ;;  %v1867_v46 = vpop.xlane.xlu0 %387 }
  0xfc   : > { %729 = vadd.xlane.f32.xlu1 %v676_v44  ;;  %727 = vadd.xlane.f32.xlu0 %v675_v48  ;;  %v683_v48 = vsel %vm1774_vm6, %v1648_v14, 0.0 }
  0xfd   : > { %v1872_v49 = vpop.xlane.xlu1 %393  ;;  %v1877_v56 = vpop.xlane.xlu0 %391 }
 0x100   : > { %733 = vadd.xlane.f32.xlu1 %v678_v51  ;;  %731 = vadd.xlane.f32.xlu0 %v677_v58  ;;  %v686_v58 = vsel %vm1774_vm6, %v1657_v25, 0.0 }
 0x101   : > { %v1882_v62 = vpop.xlane.xlu1 %397  ;;  %v1887_v6 = vpop.xlane.xlu0 %395 }
 0x104   : > { %737 = vadd.xlane.f32.xlu1 %v680_v3  ;;  %735 = vadd.xlane.f32.xlu0 %v679_v13  ;;  %v685_v13 = vsel %vm1774_vm6, %v1662_v27, 0.0 }
 0x105   : > { %v1892_v17 = vpop.xlane.xlu1 %401  ;;  %v1897_v26 = vpop.xlane.xlu0 %399 }
 0x108   : > { %741 = vadd.xlane.f32.xlu1 %v682_v22  ;;  %739 = vadd.xlane.f32.xlu0 %v681_v33  ;;  %v818_v33 = vsel %vm218_vm7, %v1464_v15, 0.0  ;;  %v819_v15 = vsel %vm218_vm7, %v1449_v5, 0.0 }
 0x109   : > { %v1902_v36 = vpop.xlane.xlu1 %405  ;;  %v1907_v44 = vpop.xlane.xlu0 %403 }
 0x10c   : > { %745 = vadd.xlane.f32.xlu1 %v684_v43  ;;  %743 = vadd.xlane.f32.xlu0 %v683_v48  ;;  %v817_v48 = vsel %vm218_vm7, %v1454_v9, 0.0  ;;  %v822_v9 = vsel %vm218_vm7, %v1475_v21, 0.0  ;;  %v823_v21 = vsel %vm218_vm7, %v1494_v31, 0.0 }
 0x10d   : > { %v1912_v51 = vpop.xlane.xlu1 %409  ;;  %v1917_v3 = vpop.xlane.xlu0 %407 }
 0x110   : > { %749 = vadd.xlane.f32.xlu1 %v686_v58  ;;  %747 = vadd.xlane.f32.xlu0 %v685_v13  ;;  %v820_v58 = vsel %vm218_vm7, %v1456_v10, 0.0  ;;  %v821_v10 = vsel %vm218_vm7, %v1480_v23, 0.0 }
 0x111   : > { %v1923_v22 = vpop.xlane.xlu1 %413  ;;  %v1928_v43 = vpop.xlane.xlu0 %411 }
 0x112   : > { %2481 = vst [vmem:[#allocation8_spill] sm:$0xff] %v1928_v43 }
 0x114   : > { %851 = vadd.xlane.f32.xlu1 %v818_v33  ;;  %849 = vadd.xlane.f32.xlu0 %v817_v48  ;;  %v824_v48 = vsel %vm218_vm7, %v1489_v29, 0.0  ;;  %v826_v29 = vsel %vm218_vm7, %v1503_v37, 0.0 }
 0x115   : > { %v1933_v38 = vpop.xlane.xlu1 %417  ;;  %v1938_v13 = vpop.xlane.xlu0 %415 }
 0x116   : > { %2482 = vst [vmem:[#allocation9_spill] sm:$0xff] %v1938_v13 }
 0x118   : > { %855 = vadd.xlane.f32.xlu1 %v820_v58  ;;  %853 = vadd.xlane.f32.xlu0 %v819_v15  ;;  %v2470_v15 = vmov 0.0  }
 0x119   : > { %v1943_v43 = vpop.xlane.xlu1 %421  ;;  %v1948_v33 = vpop.xlane.xlu0 %419  ;;  %v1966_v23 = vsel %vm224_vm8, 1.0, %v2470_v15 }
 0x11a   : > { %2483 = vst [vmem:[#allocation10_spill] sm:$0xff] %v1943_v43  ;;  %2484 = vst [vmem:[#allocation11_spill] sm:$0xff] %v1948_v33  ;;  %v825_v33 = vsel %vm218_vm7, %v1508_v39, 0.0 }
 0x11c   : > { %859 = vadd.xlane.f32.xlu1 %v822_v9  ;;  %857 = vadd.xlane.f32.xlu0 %v821_v10  ;;  %v1969_v9 = vsel %vm221_vm9, 1.0, %v2470_v15 }
 0x11d   : > { %v1955_v5 = vpop.xlane.xlu1 %425  ;;  %v1960_v58 = vpop.xlane.xlu0 %423  ;;  %v427_v15 = vmul.f32 %v1969_v9, %v1807_v57  ;;  %v827_v57 = vsel %vm218_vm7, %v1522_v47, 0.0 }
 0x11e   : > { %2485 = vst [vmem:[#allocation12_spill] sm:$0xff] %v1955_v5  ;;  %2486 = vst [vmem:[#allocation13_spill] sm:$0xff] %v1960_v58  ;;  %v428_v58 = vmul.f32 %v1969_v9, %v1817_v2  ;;  %v828_v2 = vsel %vm218_vm7, %v1517_v45, 0.0 }
 0x120   : > { %863 = vadd.xlane.f32.xlu1 %v824_v48  ;;  %861 = vadd.xlane.f32.xlu0 %v823_v21 }
 0x121   : > { %v528_v10 = vpop.xlane.xlu1 %527  ;;  %v526_v31 = vpop.xlane.xlu0 %525 }
 0x122   : > { %v590_v5 = vmul.f32 %v1966_v23, %v528_v10  ;;  %v589_v48 = vmul.f32 %v1966_v23, %v526_v31  ;;  %v430_v10 = vmul.f32 %v1969_v9, %v1812_v59  ;;  %v830_v59 = vsel %vm218_vm7, %v1531_v53, 0.0 }
 0x124   : > { %v1983_v21 = vadd.f32 %v590_v5, %v428_v58  ;;  %867 = vadd.xlane.f32.xlu1 %v826_v29  ;;  %v1985_v43 = vadd.f32 %v589_v48, %v427_v15  ;;  %865 = vadd.xlane.f32.xlu0 %v825_v33  ;;  %v429_v5 = vmul.f32 %v1969_v9, %v1802_v54  ;;  %v829_v54 = vsel %vm218_vm7, %v1536_v55, 0.0 }
 0x125   : > { %v532_v37 = vpop.xlane.xlu1 %531  ;;  %v530_v13 = vpop.xlane.xlu0 %529  ;;  %v432_v29 = vmul.f32 %v1969_v9, %v1822_v4  ;;  %v832_v4 = vsel %vm218_vm7, %v1545_v61, 0.0 }
 0x126   : > { %v592_v39 = vmul.f32 %v1966_v23, %v532_v37  ;;  %v591_v33 = vmul.f32 %v1966_v23, %v530_v13  ;;  %v431_v13 = vmul.f32 %v1969_v9, %v1827_v8  ;;  %v831_v8 = vsel %vm218_vm7, %v1550_v63, 0.0 }
 0x128   : > { %v1999_v58 = vadd.f32 %v592_v39, %v430_v10  ;;  %871 = vadd.xlane.f32.xlu1 %v828_v2  ;;  %v2001_v15 = vadd.f32 %v591_v33, %v429_v5  ;;  %869 = vadd.xlane.f32.xlu0 %v827_v57  ;;  %v434_v10 = vmul.f32 %v1969_v9, %v1832_v16  ;;  %v834_v16 = vsel %vm218_vm7, %v1559_v7, 0.0 }
 0x129   : > { %v536_v45 = vpop.xlane.xlu1 %535  ;;  %v534_v31 = vpop.xlane.xlu0 %533  ;;  %v433_v57 = vmul.f32 %v1969_v9, %v1837_v19  ;;  %v833_v19 = vsel %vm218_vm7, %v1564_v11, 0.0 }
 0x12a   : > { %v594_v47 = vmul.f32 %v1966_v23, %v536_v45  ;;  %v593_v48 = vmul.f32 %v1966_v23, %v534_v31 }
 0x12c   : > { %v2015_v37 = vadd.f32 %v594_v47, %v432_v29  ;;  %875 = vadd.xlane.f32.xlu1 %v830_v59  ;;  %v2017_v2 = vadd.f32 %v593_v48, %v431_v13  ;;  %873 = vadd.xlane.f32.xlu0 %v829_v54  ;;  %v436_v59 = vmul.f32 %v1969_v9, %v1842_v24  ;;  %v836_v24 = vsel %vm218_vm7, %v1573_v18, 0.0 }
 0x12d   : > { %v540_v53 = vpop.xlane.xlu1 %539  ;;  %v538_v39 = vpop.xlane.xlu0 %537  ;;  %v435_v47 = vmul.f32 %v1969_v9, %v1847_v30  ;;  %v438_v48 = vmul.f32 %v1969_v9, %v1852_v35  ;;  %v835_v30 = vsel %vm218_vm7, %v1578_v20, 0.0  ;;  %v838_v35 = vsel %vm218_vm7, %v1587_v28, 0.0 }
 0x12e   : > { %v596_v55 = vmul.f32 %v1966_v23, %v540_v53  ;;  %v595_v5 = vmul.f32 %v1966_v23, %v538_v39 }
 0x130   : > { %v2031_v33 = vadd.f32 %v596_v55, %v434_v10  ;;  %879 = vadd.xlane.f32.xlu1 %v832_v4  ;;  %v2033_v45 = vadd.f32 %v595_v5, %v433_v57  ;;  %877 = vadd.xlane.f32.xlu0 %v831_v8  ;;  %v437_v4 = vmul.f32 %v1969_v9, %v1857_v41  ;;  %v837_v41 = vsel %vm218_vm7, %v1592_v32, 0.0 }
 0x131   : > { %v544_v61 = vpop.xlane.xlu1 %543  ;;  %v542_v29 = vpop.xlane.xlu0 %541  ;;  %v440_v8 = vmul.f32 %v1969_v9, %v1862_v34  ;;  %v439_v5 = vmul.f32 %v1969_v9, %v1867_v46  ;;  %v840_v34 = vsel %vm218_vm7, %v1601_v40, 0.0  ;;  %v839_v46 = vsel %vm218_vm7, %v1606_v42, 0.0 }
 0x132   : > { %v598_v63 = vmul.f32 %v1966_v23, %v544_v61  ;;  %v597_v31 = vmul.f32 %v1966_v23, %v542_v29 }
 0x134   : > { %v2047_v54 = vadd.f32 %v598_v63, %v436_v59  ;;  %883 = vadd.xlane.f32.xlu1 %v834_v16  ;;  %v2049_v13 = vadd.f32 %v597_v31, %v435_v47  ;;  %881 = vadd.xlane.f32.xlu0 %v833_v19  ;;  %v442_v63 = vmul.f32 %v1969_v9, %v1872_v49  ;;  %v842_v49 = vsel %vm218_vm7, %v1615_v50, 0.0 }
 0x135   : > { %v548_v7 = vpop.xlane.xlu1 %547  ;;  %v546_v53 = vpop.xlane.xlu0 %545  ;;  %v441_v19 = vmul.f32 %v1969_v9, %v1877_v56  ;;  %v841_v56 = vsel %vm218_vm7, %v1620_v52, 0.0 }
 0x136   : > { %v600_v11 = vmul.f32 %v1966_v23, %v548_v7  ;;  %v599_v10 = vmul.f32 %v1966_v23, %v546_v53 }
 0x138   : > { %v2063_v55 = vadd.f32 %v600_v11, %v438_v48  ;;  %887 = vadd.xlane.f32.xlu1 %v836_v24  ;;  %v2065_v39 = vadd.f32 %v599_v10, %v437_v4  ;;  %885 = vadd.xlane.f32.xlu0 %v835_v30  ;;  %v444_v24 = vmul.f32 %v1969_v9, %v1882_v62  ;;  %v844_v62 = vsel %vm218_vm7, %v1629_v60, 0.0 }
 0x139   : > { %v552_v18 = vpop.xlane.xlu1 %551  ;;  %v550_v57 = vpop.xlane.xlu0 %549  ;;  %v443_v11 = vmul.f32 %v1969_v9, %v1887_v6  ;;  %v446_v10 = vmul.f32 %v1969_v9, %v1892_v17  ;;  %v843_v6 = vsel %vm218_vm7, %v1634_v0, 0.0  ;;  %v846_v17 = vsel %vm218_vm7, %v1643_v12, 0.0 }
 0x13a   : > { %v602_v20 = vmul.f32 %v1966_v23, %v552_v18  ;;  %v601_v61 = vmul.f32 %v1966_v23, %v550_v57 }
 0x13c   : > { %v2079_v16 = vadd.f32 %v602_v20, %v440_v8  ;;  %891 = vadd.xlane.f32.xlu1 %v838_v35  ;;  %v2081_v59 = vadd.f32 %v601_v61, %v439_v5  ;;  %889 = vadd.xlane.f32.xlu0 %v837_v41  ;;  %v445_v35 = vmul.f32 %v1969_v9, %v1897_v26  ;;  %v845_v26 = vsel %vm218_vm7, %v1648_v14, 0.0 }
 0x13d   : > { %v556_v28 = vpop.xlane.xlu1 %555  ;;  %v554_v29 = vpop.xlane.xlu0 %553  ;;  %v448_v41 = vmul.f32 %v1969_v9, %v1902_v36  ;;  %v447_v61 = vmul.f32 %v1969_v9, %v1907_v44  ;;  %v848_v36 = vsel %vm218_vm7, %v1657_v25, 0.0  ;;  %v847_v44 = vsel %vm218_vm7, %v1662_v27, 0.0 }
 0x13e   : > { %v604_v32 = vmul.f32 %v1966_v23, %v556_v28  ;;  %v603_v47 = vmul.f32 %v1966_v23, %v554_v29 }
 0x140   : > { %v2095_v31 = vadd.f32 %v604_v32, %v442_v63  ;;  %895 = vadd.xlane.f32.xlu1 %v840_v34  ;;  %v2097_v7 = vadd.f32 %v603_v47, %v441_v19  ;;  %893 = vadd.xlane.f32.xlu0 %v839_v46  ;;  %v450_v32 = vmul.f32 %v1969_v9, %v1912_v51 }
 0x141   : > { %v560_v40 = vpop.xlane.xlu1 %559  ;;  %v558_v48 = vpop.xlane.xlu0 %557  ;;  %v449_v46 = vmul.f32 %v1969_v9, %v1917_v3  ;;  %v452_v51 = vmul.f32 %v1969_v9, %v1923_v22  ;;  %v2489_v22 = vld [vmem:[#allocation9_spill] sm:$0xff] }
 0x142   : > { %v606_v42 = vmul.f32 %v1966_v23, %v560_v40  ;;  %v605_v53 = vmul.f32 %v1966_v23, %v558_v48 }
 0x144   : > { %v2111_v30 = vadd.f32 %v606_v42, %v444_v24  ;;  %899 = vadd.xlane.f32.xlu1 %v842_v49  ;;  %v2113_v4 = vadd.f32 %v605_v53, %v443_v11  ;;  %897 = vadd.xlane.f32.xlu0 %v841_v56  ;;  %v2487_v42 = vld [vmem:[#allocation8_spill] sm:$0xff]  ;;  %v454_v53 = vmul.f32 %v1969_v9, %v1933_v38  ;;  %v2493_v38 = vld [vmem:[#allocation11_spill] sm:$0xff] }
 0x145   : > { %v564_v50 = vpop.xlane.xlu1 %563  ;;  %v562_v18 = vpop.xlane.xlu0 %561  ;;  %v451_v27 = vmul.f32 %v1969_v9, %v2487_v42 }
 0x146   : > { %v608_v52 = vmul.f32 %v1966_v23, %v564_v50  ;;  %v607_v8 = vmul.f32 %v1966_v23, %v562_v18 }
 0x148   : > { %v2127_v20 = vadd.f32 %v608_v52, %v446_v10  ;;  %903 = vadd.xlane.f32.xlu1 %v844_v62  ;;  %v2129_v57 = vadd.f32 %v607_v8, %v445_v35  ;;  %901 = vadd.xlane.f32.xlu0 %v843_v6  ;;  %v453_v10 = vmul.f32 %v1969_v9, %v2489_v22  ;;  %v2492_v8 = vld [vmem:[#allocation10_spill] sm:$0xff] }
 0x149   : > { %v568_v60 = vpop.xlane.xlu1 %567  ;;  %v566_v5 = vpop.xlane.xlu0 %565 }
 0x14a   : > { %v610_v0 = vmul.f32 %v1966_v23, %v568_v60  ;;  %v609_v28 = vmul.f32 %v1966_v23, %v566_v5  ;;  %v456_v60 = vmul.f32 %v1969_v9, %v2492_v8 }
 0x14c   : > { %v2143_v34 = vadd.f32 %v610_v0, %v448_v41  ;;  %907 = vadd.xlane.f32.xlu1 %v846_v17  ;;  %v2145_v63 = vadd.f32 %v609_v28, %v447_v61  ;;  %905 = vadd.xlane.f32.xlu0 %v845_v26  ;;  %v455_v0 = vmul.f32 %v1969_v9, %v2493_v38 }
 0x14d   : > { %v572_v12 = vpop.xlane.xlu1 %571  ;;  %v570_v29 = vpop.xlane.xlu0 %569 }
 0x14e   : > { %v612_v14 = vmul.f32 %v1966_v23, %v572_v12  ;;  %v611_v19 = vmul.f32 %v1966_v23, %v570_v29  ;;  %v2496_v12 = vld [vmem:[#allocation12_spill] sm:$0xff]  ;;  %v2497_v29 = vld [vmem:[#allocation13_spill] sm:$0xff] }
 0x150   : > { %v2159_v47 = vadd.f32 %v612_v14, %v450_v32  ;;  %911 = vadd.xlane.f32.xlu1 %v848_v36  ;;  %v2161_v40 = vadd.f32 %v611_v19, %v449_v46  ;;  %909 = vadd.xlane.f32.xlu0 %v847_v44  ;;  %v458_v36 = vmul.f32 %v1969_v9, %v2496_v12 }
 0x151   : > { %v576_v25 = vpop.xlane.xlu1 %575  ;;  %v574_v24 = vpop.xlane.xlu0 %573  ;;  %v457_v44 = vmul.f32 %v1969_v9, %v2497_v29 }
 0x152   : > { %v614_v49 = vmul.f32 %v1966_v23, %v576_v25  ;;  %v613_v3 = vmul.f32 %v1966_v23, %v574_v24 }
 0x154   : > { %v2169_v48 = vadd.f32 %v614_v49, %v452_v51  ;;  %v2171_v56 = vadd.f32 %v613_v3, %v451_v27 }
 0x155   : > { %v580_v11 = vpop.xlane.xlu1 %579  ;;  %v578_v62 = vpop.xlane.xlu0 %577 }
 0x156   : > { %2488 = vst [vmem:[#allocation8_spill] sm:$0xff] %v2171_v56  ;;  %v616_v50 = vmul.f32 %v1966_v23, %v580_v11  ;;  %v615_v52 = vmul.f32 %v1966_v23, %v578_v62 }
 0x158   : > { %v2179_v18 = vadd.f32 %v616_v50, %v454_v53  ;;  %v2181_v6 = vadd.f32 %v615_v52, %v453_v10 }
 0x159   : > { %v584_v35 = vpop.xlane.xlu1 %583  ;;  %v582_v41 = vpop.xlane.xlu0 %581 }
 0x15a   : > { %2490 = vst [vmem:[#allocation9_spill] sm:$0xff] %v2179_v18  ;;  %2491 = vst [vmem:[#allocation14_spill] sm:$0xff] %v2181_v6  ;;  %v618_v17 = vmul.f32 %v1966_v23, %v584_v35  ;;  %v617_v5 = vmul.f32 %v1966_v23, %v582_v41 }
 0x15c   : > { %v2189_v26 = vadd.f32 %v618_v17, %v456_v60  ;;  %v2191_v61 = vadd.f32 %v617_v5, %v455_v0 }
 0x15d   : > { %v588_v28 = vpop.xlane.xlu1 %587  ;;  %v586_v14 = vpop.xlane.xlu0 %585 }
 0x15e   : > { %2494 = vst [vmem:[#allocation10_spill] sm:$0xff] %v2189_v26  ;;  %2495 = vst [vmem:[#allocation11_spill] sm:$0xff] %v2191_v61  ;;  %v620_v32 = vmul.f32 %v1966_v23, %v588_v28  ;;  %v619_v46 = vmul.f32 %v1966_v23, %v586_v14 }
 0x160   : > { %v2199_v19 = vadd.f32 %v620_v32, %v458_v36  ;;  %v2201_v25 = vadd.f32 %v619_v46, %v457_v44  ;;  %v2503_v46 = vmov 0.0  }
 0x161   : > { %v690_v51 = vpop.xlane.xlu1 %689  ;;  %v688_v49 = vpop.xlane.xlu0 %687  ;;  %v2263_v18 = vsel %vm230_vm11, 1.0, %v2503_v46 }
 0x162   : > { %2498 = vst [vmem:[#allocation12_spill] sm:$0xff] %v2199_v19  ;;  %2499 = vst [vmem:[#allocation13_spill] sm:$0xff] %v2201_v25  ;;  %v2253_v25 = vsel %vm227_vm10, 1.0, %v2503_v46 }
 0x163   : > { %v752_v61 = vmul.f32 %v2253_v25, %v690_v51  ;;  %v751_v6 = vmul.f32 %v2253_v25, %v688_v49 }
 0x165   : > { %v694_v24 = vpop.xlane.xlu1 %693  ;;  %v692_v42 = vpop.xlane.xlu0 %691 }
 0x166   : > { %v753_v51 = vmul.f32 %v2253_v25, %v692_v42 }
 0x168   : > { %v785_v46 = vadd.f32 %v753_v51, %v2001_v15 }
 0x169   : > { %v698_v27 = vpop.xlane.xlu1 %697  ;;  %v696_v3 = vpop.xlane.xlu0 %695 }
 0x16d   : > { %v702_v11 = vpop.xlane.xlu1 %701  ;;  %v2203_v53 = vpop.xlane.xlu0 %699 }
 0x16e   : > { %v757_v51 = vmul.f32 %v2253_v25, %v2203_v53 }
 0x170   : > { %v789_v53 = vadd.f32 %v757_v51, %v2033_v45 }
 0x171   : > { %v2205_v50 = vpop.xlane.xlu1 %705  ;;  %v2207_v62 = vpop.xlane.xlu0 %703 }
 0x175   : > { %v2209_v9 = vpop.xlane.xlu1 %709  ;;  %v2211_v23 = vpop.xlane.xlu0 %707 }
 0x179   : > { %v2213_v22 = vpop.xlane.xlu1 %713  ;;  %v2215_v10 = vpop.xlane.xlu0 %711 }
 0x17d   : > { %v2217_v52 = vpop.xlane.xlu1 %717  ;;  %v2219_v35 = vpop.xlane.xlu0 %715 }
 0x181   : > { %v2221_v8 = vpop.xlane.xlu1 %721  ;;  %v2223_v60 = vpop.xlane.xlu0 %719 }
 0x185   : > { %v2225_v17 = vpop.xlane.xlu1 %725  ;;  %v2227_v41 = vpop.xlane.xlu0 %723 }
 0x189   : > { %v2229_v38 = vpop.xlane.xlu1 %729  ;;  %v2231_v0 = vpop.xlane.xlu0 %727 }
 0x18d   : > { %v2233_v5 = vpop.xlane.xlu1 %733  ;;  %v2235_v28 = vpop.xlane.xlu0 %731 }
 0x191   : > { %v2237_v12 = vpop.xlane.xlu1 %737  ;;  %v2239_v36 = vpop.xlane.xlu0 %735 }
 0x195   : > { %v2241_v32 = vpop.xlane.xlu1 %741  ;;  %v2245_v14 = vpop.xlane.xlu0 %739 }
 0x196   : > { %2500 = vst [vmem:[#allocation15_spill] sm:$0xff] %v2245_v14  ;;  %v754_v14 = vmul.f32 %v2253_v25, %v694_v24 }
 0x199   : > { %v2248_v29 = vpop.xlane.xlu1 %745  ;;  %v2250_v44 = vpop.xlane.xlu0 %743 }
 0x19a   : > { %2501 = vst [vmem:[#allocation16_spill] sm:$0xff] %v2248_v29  ;;  %2502 = vst [vmem:[#allocation17_spill] sm:$0xff] %v2250_v44  ;;  %v784_v44 = vadd.f32 %v752_v61, %v1983_v21 }
 0x19d   : > { %v2256_v19 = vpop.xlane.xlu1 %749  ;;  %v2259_v26 = vpop.xlane.xlu0 %747 }
 0x19e   : > { %2504 = vst [vmem:[#allocation18_spill] sm:$0xff] %v2256_v19  ;;  %2505 = vst [vmem:[#allocation19_spill] sm:$0xff] %v2259_v26  ;;  %v783_v19 = vadd.f32 %v751_v6, %v1985_v43  ;;  %v756_v43 = vmul.f32 %v2253_v25, %v698_v27  ;;  %v755_v26 = vmul.f32 %v2253_v25, %v696_v3 }
 0x1a0   : > { %v788_v27 = vadd.f32 %v756_v43, %v2015_v37  ;;  %v787_v3 = vadd.f32 %v755_v26, %v2017_v2 }
 0x1a1   : > { %v852_v29 = vpop.xlane.xlu1 %851  ;;  %v850_v1 = vpop.xlane.xlu0 %849 }
 0x1a2   : > { %v914_v56 = vmul.f32 %v2263_v18, %v852_v29  ;;  %v913_v49 = vmul.f32 %v2263_v18, %v850_v1  ;;  %v786_v29 = vadd.f32 %v754_v14, %v1999_v58  ;;  %v758_v14 = vmul.f32 %v2253_v25, %v702_v11 }
 0x1a4   : > { %v946_v21 = vadd.f32 %v914_v56, %v784_v44  ;;  %v945_v61 = vadd.f32 %v913_v49, %v783_v19  ;;  %v790_v11 = vadd.f32 %v758_v14, %v2031_v33  ;;  %v764_v14 = vmul.f32 %v2253_v25, %v2213_v22 }
 0x1a5   : > { %v856_v24 = vpop.xlane.xlu1 %855  ;;  %v854_v42 = vpop.xlane.xlu0 %853 }
 0x1a6   : > { %979 = vst.msk [vmem:[%s2273_s22 + $0x8] sm:$0xff] %vm977_vm12, %v946_v21  ;;  %v916_v6 = vmul.f32 %v2263_v18, %v856_v24  ;;  %978 = vst.msk [vmem:[%s2273_s22] sm:$0xff] %vm977_vm12, %v945_v61  ;;  %v915_v56 = vmul.f32 %v2263_v18, %v854_v42  ;;  %v760_v24 = vmul.f32 %v2253_v25, %v2205_v50 }
 0x1a7   : > { %v796_v22 = vadd.f32 %v764_v14, %v2079_v16  ;;  %v774_v14 = vmul.f32 %v2253_v25, %v2233_v5 }
 0x1a8   : > { %v948_v19 = vadd.f32 %v916_v6, %v786_v29  ;;  %v947_v44 = vadd.f32 %v915_v56, %v785_v46  ;;  %v759_v29 = vmul.f32 %v2253_v25, %v2207_v62  ;;  %v792_v50 = vadd.f32 %v760_v24, %v2047_v54 }
 0x1a9   : > { %v860_v58 = vpop.xlane.xlu1 %859  ;;  %v858_v15 = vpop.xlane.xlu0 %857  ;;  %v762_v46 = vmul.f32 %v2253_v25, %v2209_v9  ;;  %v806_v5 = vadd.f32 %v774_v14, %v2159_v47 }
 0x1aa   : > { %981 = vst.msk [vmem:[%s2273_s22 + $0x18] sm:$0xff] %vm977_vm12, %v948_v19  ;;  %v918_v1 = vmul.f32 %v2263_v18, %v860_v58  ;;  %980 = vst.msk [vmem:[%s2273_s22 + $0x10] sm:$0xff] %vm977_vm12, %v947_v44  ;;  %v917_v49 = vmul.f32 %v2263_v18, %v858_v15  ;;  %v791_v62 = vadd.f32 %v759_v29, %v2049_v13 }
 0x1ab   : > { %v761_v19 = vmul.f32 %v2253_v25, %v2211_v23  ;;  %v794_v9 = vadd.f32 %v762_v46, %v2063_v55  ;;  %v763_v15 = vmul.f32 %v2253_v25, %v2215_v10  ;;  %v767_v29 = vmul.f32 %v2253_v25, %v2223_v60 }
 0x1ac   : > { %v950_v21 = vadd.f32 %v918_v1, %v788_v27  ;;  %v949_v61 = vadd.f32 %v917_v49, %v787_v3  ;;  %v769_v46 = vmul.f32 %v2253_v25, %v2227_v41 }
 0x1ad   : > { %v864_v37 = vpop.xlane.xlu1 %863  ;;  %v862_v26 = vpop.xlane.xlu0 %861  ;;  %v793_v23 = vadd.f32 %v761_v19, %v2065_v39  ;;  %v795_v10 = vadd.f32 %v763_v15, %v2081_v59  ;;  %v799_v60 = vadd.f32 %v767_v29, %v2113_v4  ;;  %v772_v19 = vmul.f32 %v2253_v25, %v2229_v38 }
 0x1ae   : > { %983 = vst.msk [vmem:[%s2273_s22 + $0x28] sm:$0xff] %vm977_vm12, %v950_v21  ;;  %v920_v2 = vmul.f32 %v2263_v18, %v864_v37  ;;  %982 = vst.msk [vmem:[%s2273_s22 + $0x20] sm:$0xff] %vm977_vm12, %v949_v61  ;;  %v919_v43 = vmul.f32 %v2263_v18, %v862_v26  ;;  %v766_v21 = vmul.f32 %v2253_v25, %v2217_v52 }
 0x1af   : > { %v765_v37 = vmul.f32 %v2253_v25, %v2219_v35  ;;  %v768_v26 = vmul.f32 %v2253_v25, %v2221_v8  ;;  %v801_v41 = vadd.f32 %v769_v46, %v2129_v57  ;;  %v804_v38 = vadd.f32 %v772_v19, %v2143_v34 }
 0x1b0   : > { %v952_v6 = vadd.f32 %v920_v2, %v790_v11  ;;  %v951_v33 = vadd.f32 %v919_v43, %v789_v53  ;;  %v798_v52 = vadd.f32 %v766_v21, %v2095_v31 }
 0x1b1   : > { %v868_v42 = vpop.xlane.xlu1 %867  ;;  %v866_v56 = vpop.xlane.xlu0 %865  ;;  %v797_v35 = vadd.f32 %v765_v37, %v2097_v7  ;;  %v800_v8 = vadd.f32 %v768_v26, %v2111_v30 }
 0x1b2   : > { %985 = vst.msk [vmem:[%s2273_s22 + $0x38] sm:$0xff] %vm977_vm12, %v952_v6  ;;  %v922_v45 = vmul.f32 %v2263_v18, %v868_v42  ;;  %984 = vst.msk [vmem:[%s2273_s22 + $0x30] sm:$0xff] %vm977_vm12, %v951_v33  ;;  %v921_v44 = vmul.f32 %v2263_v18, %v866_v56  ;;  %v770_v42 = vmul.f32 %v2253_v25, %v2225_v17 }
 0x1b4   : > { %v954_v58 = vadd.f32 %v922_v45, %v792_v50  ;;  %v953_v54 = vadd.f32 %v921_v44, %v791_v62  ;;  %v802_v17 = vadd.f32 %v770_v42, %v2127_v20 }
 0x1b5   : > { %v872_v27 = vpop.xlane.xlu1 %871  ;;  %v870_v1 = vpop.xlane.xlu0 %869 }
 0x1b6   : > { %987 = vst.msk [vmem:[%s2273_s22 + $0x48] sm:$0xff] %vm977_vm12, %v954_v58  ;;  %v924_v13 = vmul.f32 %v2263_v18, %v872_v27  ;;  %986 = vst.msk [vmem:[%s2273_s22 + $0x40] sm:$0xff] %vm977_vm12, %v953_v54  ;;  %v923_v3 = vmul.f32 %v2263_v18, %v870_v1  ;;  %v771_v58 = vmul.f32 %v2253_v25, %v2231_v0 }
 0x1b7   : > { %v773_v1 = vmul.f32 %v2253_v25, %v2235_v28 }
 0x1b8   : > { %v956_v51 = vadd.f32 %v924_v13, %v794_v9  ;;  %v955_v55 = vadd.f32 %v923_v3, %v793_v23  ;;  %v803_v0 = vadd.f32 %v771_v58, %v2145_v63 }
 0x1b9   : > { %v876_v49 = vpop.xlane.xlu1 %875  ;;  %v874_v61 = vpop.xlane.xlu0 %873  ;;  %v805_v28 = vadd.f32 %v773_v1, %v2161_v40 }
 0x1ba   : > { %989 = vst.msk [vmem:[%s2273_s22 + $0x58] sm:$0xff] %vm977_vm12, %v956_v51  ;;  %v926_v39 = vmul.f32 %v2263_v18, %v876_v49  ;;  %988 = vst.msk [vmem:[%s2273_s22 + $0x50] sm:$0xff] %vm977_vm12, %v955_v55  ;;  %v925_v11 = vmul.f32 %v2263_v18, %v874_v61  ;;  %v776_v51 = vmul.f32 %v2253_v25, %v2237_v12 }
 0x1bb   : > { %v775_v49 = vmul.f32 %v2253_v25, %v2239_v36  ;;  %v778_v61 = vmul.f32 %v2253_v25, %v2241_v32  ;;  %v2506_v36 = vld [vmem:[#allocation8_spill] sm:$0xff]  ;;  %v2508_v32 = vld [vmem:[#allocation9_spill] sm:$0xff] }
 0x1bc   : > { %v958_v24 = vadd.f32 %v926_v39, %v796_v22  ;;  %v957_v16 = vadd.f32 %v925_v11, %v795_v10  ;;  %v808_v12 = vadd.f32 %v776_v51, %v2169_v48  ;;  %v2507_v11 = vld [vmem:[#allocation15_spill] sm:$0xff] }
 0x1bd   : > { %v880_v2 = vpop.xlane.xlu1 %879  ;;  %v878_v53 = vpop.xlane.xlu0 %877  ;;  %v807_v37 = vadd.f32 %v775_v49, %v2506_v36  ;;  %v810_v26 = vadd.f32 %v778_v61, %v2508_v32 }
 0x1be   : > { %991 = vst.msk [vmem:[%s2273_s22 + $0x68] sm:$0xff] %vm977_vm12, %v958_v24  ;;  %v928_v59 = vmul.f32 %v2263_v18, %v880_v2  ;;  %990 = vst.msk [vmem:[%s2273_s22 + $0x60] sm:$0xff] %vm977_vm12, %v957_v16  ;;  %v927_v43 = vmul.f32 %v2263_v18, %v878_v53  ;;  %v777_v24 = vmul.f32 %v2253_v25, %v2507_v11 }
 0x1c0   : > { %v960_v6 = vadd.f32 %v928_v59, %v798_v52  ;;  %v959_v31 = vadd.f32 %v927_v43, %v797_v35  ;;  %v2509_v59 = vld [vmem:[#allocation16_spill] sm:$0xff]  ;;  %v2510_v43 = vld [vmem:[#allocation14_spill] sm:$0xff] }
 0x1c1   : > { %v884_v33 = vpop.xlane.xlu1 %883  ;;  %v882_v50 = vpop.xlane.xlu0 %881  ;;  %v780_v53 = vmul.f32 %v2253_v25, %v2509_v59 }
 0x1c2   : > { %993 = vst.msk [vmem:[%s2273_s22 + $0x78] sm:$0xff] %vm977_vm12, %v960_v6  ;;  %v930_v7 = vmul.f32 %v2263_v18, %v884_v33  ;;  %992 = vst.msk [vmem:[%s2273_s22 + $0x70] sm:$0xff] %vm977_vm12, %v959_v31  ;;  %v929_v45 = vmul.f32 %v2263_v18, %v882_v50  ;;  %v809_v6 = vadd.f32 %v777_v24, %v2510_v43  ;;  %v2511_v31 = vld [vmem:[#allocation17_spill] sm:$0xff] }
 0x1c3   : > { %v779_v33 = vmul.f32 %v2253_v25, %v2511_v31 }
 0x1c4   : > { %v962_v56 = vadd.f32 %v930_v7, %v800_v8  ;;  %v961_v30 = vadd.f32 %v929_v45, %v799_v60  ;;  %v2512_v60 = vld [vmem:[#allocation10_spill] sm:$0xff] }
 0x1c5   : > { %v888_v62 = vpop.xlane.xlu1 %887  ;;  %v886_v44 = vpop.xlane.xlu0 %885  ;;  %v812_v46 = vadd.f32 %v780_v53, %v2512_v60  ;;  %v2513_v45 = vld [vmem:[#allocation18_spill] sm:$0xff] }
 0x1c6   : > { %995 = vst.msk [vmem:[%s2273_s22 + $0x88] sm:$0xff] %vm977_vm12, %v962_v56  ;;  %v932_v4 = vmul.f32 %v2263_v18, %v888_v62  ;;  %994 = vst.msk [vmem:[%s2273_s22 + $0x80] sm:$0xff] %vm977_vm12, %v961_v30  ;;  %v931_v54 = vmul.f32 %v2263_v18, %v886_v44  ;;  %v782_v56 = vmul.f32 %v2253_v25, %v2513_v45 }
 0x1c8   : > { %v964_v27 = vadd.f32 %v932_v4, %v802_v17  ;;  %v963_v20 = vadd.f32 %v931_v54, %v801_v41  ;;  %v2514_v17 = vld [vmem:[#allocation11_spill] sm:$0xff] }
 0x1c9   : > { %v892_v9 = vpop.xlane.xlu1 %891  ;;  %v890_v13 = vpop.xlane.xlu0 %889  ;;  %v811_v19 = vadd.f32 %v779_v33, %v2514_v17  ;;  %v2515_v4 = vld [vmem:[#allocation19_spill] sm:$0xff] }
 0x1ca   : > { %997 = vst.msk [vmem:[%s2273_s22 + $0x98] sm:$0xff] %vm977_vm12, %v964_v27  ;;  %v934_v57 = vmul.f32 %v2263_v18, %v892_v9  ;;  %996 = vst.msk [vmem:[%s2273_s22 + $0x90] sm:$0xff] %vm977_vm12, %v963_v20  ;;  %v933_v23 = vmul.f32 %v2263_v18, %v890_v13  ;;  %v781_v44 = vmul.f32 %v2253_v25, %v2515_v4  ;;  %v2516_v20 = vld [vmem:[#allocation12_spill] sm:$0xff] }
 0x1cb   : > { %v814_v9 = vadd.f32 %v782_v56, %v2516_v20 }
 0x1cc   : > { %v966_v15 = vadd.f32 %v934_v57, %v804_v38  ;;  %v965_v34 = vadd.f32 %v933_v23, %v803_v0  ;;  %v2517_v57 = vld [vmem:[#allocation13_spill] sm:$0xff] }
 0x1cd   : > { %v896_v3 = vpop.xlane.xlu1 %895  ;;  %v894_v55 = vpop.xlane.xlu0 %893  ;;  %v813_v13 = vadd.f32 %v781_v44, %v2517_v57 }
 0x1ce   : > { %999 = vst.msk [vmem:[%s2273_s22 + $0xa8] sm:$0xff] %vm977_vm12, %v966_v15  ;;  %v936_v63 = vmul.f32 %v2263_v18, %v896_v3  ;;  %998 = vst.msk [vmem:[%s2273_s22 + $0xa0] sm:$0xff] %vm977_vm12, %v965_v34  ;;  %v935_v22 = vmul.f32 %v2263_v18, %v894_v55 }
 0x1d0   : > { %v968_v21 = vadd.f32 %v936_v63, %v806_v5  ;;  %v967_v47 = vadd.f32 %v935_v22, %v805_v28 }
 0x1d1   : > { %v900_v39 = vpop.xlane.xlu1 %899  ;;  %v898_v10 = vpop.xlane.xlu0 %897 }
 0x1d2   : > { %1001 = vst.msk [vmem:[%s2273_s22 + $0xb8] sm:$0xff] %vm977_vm12, %v968_v21  ;;  %v938_v40 = vmul.f32 %v2263_v18, %v900_v39  ;;  %1000 = vst.msk [vmem:[%s2273_s22 + $0xb0] sm:$0xff] %vm977_vm12, %v967_v47  ;;  %v937_v16 = vmul.f32 %v2263_v18, %v898_v10 }
 0x1d4   : > { %v970_v2 = vadd.f32 %v938_v40, %v808_v12  ;;  %v969_v48 = vadd.f32 %v937_v16, %v807_v37 }
 0x1d5   : > { %v904_v52 = vpop.xlane.xlu1 %903  ;;  %v902_v29 = vpop.xlane.xlu0 %901 }
 0x1d6   : > { %1003 = vst.msk [vmem:[%s2273_s22 + $0xc8] sm:$0xff] %vm977_vm12, %v970_v2  ;;  %v940_v35 = vmul.f32 %v2263_v18, %v904_v52  ;;  %1002 = vst.msk [vmem:[%s2273_s22 + $0xc0] sm:$0xff] %vm977_vm12, %v969_v48  ;;  %v939_v8 = vmul.f32 %v2263_v18, %v902_v29 }
 0x1d8   : > { %v972_v42 = vadd.f32 %v940_v35, %v810_v26  ;;  %v971_v7 = vadd.f32 %v939_v8, %v809_v6 }
 0x1d9   : > { %v908_v50 = vpop.xlane.xlu1 %907  ;;  %v906_v62 = vpop.xlane.xlu0 %905 }
 0x1da   : > { %1005 = vst.msk [vmem:[%s2273_s22 + $0xd8] sm:$0xff] %vm977_vm12, %v972_v42  ;;  %v942_v30 = vmul.f32 %v2263_v18, %v908_v50  ;;  %1004 = vst.msk [vmem:[%s2273_s22 + $0xd0] sm:$0xff] %vm977_vm12, %v971_v7  ;;  %v941_v41 = vmul.f32 %v2263_v18, %v906_v62 }
 0x1dc   : > { %v974_v58 = vadd.f32 %v942_v30, %v812_v46  ;;  %v973_v54 = vadd.f32 %v941_v41, %v811_v19 }
 0x1dd   : > { %v912_v27 = vpop.xlane.xlu1 %911  ;;  %v910_v14 = vpop.xlane.xlu0 %909 }
 0x1de   : > { %1007 = vst.msk [vmem:[%s2273_s22 + $0xe8] sm:$0xff] %vm977_vm12, %v974_v58  ;;  %v944_v38 = vmul.f32 %v2263_v18, %v912_v27  ;;  %1006 = vst.msk [vmem:[%s2273_s22 + $0xe0] sm:$0xff] %vm977_vm12, %v973_v54  ;;  %v943_v25 = vmul.f32 %v2263_v18, %v910_v14 }
 0x1e0   : > { %v976_v0 = vadd.f32 %v944_v38, %v814_v9  ;;  %v975_v1 = vadd.f32 %v943_v25, %v813_v13 }
 0x1e2   : > { %1009 = vst.msk [vmem:[%s2273_s22 + $0xf8] sm:$0xff] %vm977_vm12, %v976_v0  ;;  %1008 = vst.msk [vmem:[%s2273_s22 + $0xf0] sm:$0xff] %vm977_vm12, %v975_v1 }
 0x1e3 PF: > { %p15_p11 = scmp.ge.s32.totalorder %s1310_s14, 10   ;;  %s2518_s9 = smov %s1260_s10 }
 0x1e4   : > { %s2519_s10 = smov %s1264_s11  ;;  %s2520_s11 = smov %s1320_s17 }
 0x1e5   : > { %s2521_s12 = smov %s1310_s14  ;;  %17 = sbr.rel (!%p15_p11) target bundleno = 5 (0x5), region = 81 }
 0x1ec   :  { %1032 = vsyncpa [#allocation3], 1 }
 0x1ed   :  { %1034 = vsyncpa [#allocation3 + $0x1], 1 }
 0x1ee   :  { %1035 = vsyncpa [#allocation5], 1 }
 0x1ef   :  { %1037 = vsyncpa [#allocation5 + $0x1], 1 }

</bundles_post_ra>
